<compile_context>
chip_gen: v7x
topology: tpu7x:2x2x1
jax: 0.10.0
libtpu: 0.0.40
codegen_flags: <defaults>
</compile_context>

<pallas_src>
import functools
import re

import jax
import jax.numpy as jnp
from jax.experimental import pallas as pl
from jax.experimental.pallas import tpu as pltpu


def _round_up(x, m):
    return ((x + m - 1) // m) * m


def _tpu_generation():
    """Best-effort TPU generation (5, 6, 7, ...); 0 if unknown."""
    try:
        kind = jax.devices()[0].device_kind.lower()
    except Exception:
        return 0
    m = re.search(r"v(\d+)", kind)
    return int(m.group(1)) if m else 0


def _gelu_erf(x):
    # PyTorch's default nn.GELU / F.gelu is the exact (erf) form.
    return 0.5 * x * (1.0 + jax.lax.erf(x * 0.7071067811865476))


def _gelu_tanh(x):
    # PyTorch F.gelu(approximate="tanh").  tanh lowers to the EUP slot, so it
    # co-issues alongside MXU/VALU work.
    c = 0.7978845608028654  # sqrt(2/pi)
    return 0.5 * x * (1.0 + jnp.tanh(c * (x + 0.044715 * x * x * x)))


# ---------------------------------------------------------------------------
# Kernel
# ---------------------------------------------------------------------------

def _encoder_kernel(
    x_ref,
    w_pre_ref, b_pre_ref,
    # block 1 (fc1 ++ fc2 fused along the output axis, proj separate)
    w_in1_ref, b_in1_ref, wp1_ref, bp1_ref,
    # block 2
    w_in2_ref, b_in2_ref, wp2_ref, bp2_ref,
    # bottleneck
    w_lat_ref, b_lat_ref,
    o_ref,
    *, d_model, compute_dtype, gelu_dtype, use_tanh_gelu,
):
    f32 = jnp.float32
    gelu = _gelu_tanh if use_tanh_gelu else _gelu_erf

    def linear(x, w_ref, b_ref):
        # Matmul operands in compute_dtype (bf16 default / f32 exact),
        # accumulation in f32, biases kept in f32.
        return jnp.dot(x.astype(compute_dtype), w_ref[...],
                       preferred_element_type=f32) + b_ref[...]

    def gmlp_block(h, w_in_ref, b_in_ref, wp_ref, bp_ref):
        # One K=d, N=3d matmul producing [u | v | fc2(h)] in one MXU pass.
        uvs = linear(h, w_in_ref, b_in_ref)            # (TB, 3*d_model) f32
        u = uvs[:, :d_model]
        v = uvs[:, d_model:2 * d_model]
        s = uvs[:, 2 * d_model:]                       # fc2(h)
        g = gelu(u.astype(gelu_dtype)) * v.astype(gelu_dtype)
        return linear(g, wp_ref, bp_ref) + s           # proj(gelu(u)*v) + fc2(h)

    h = gelu(linear(x_ref[...], w_pre_ref, b_pre_ref).astype(gelu_dtype))
    h = gmlp_block(h, w_in1_ref, b_in1_ref, wp1_ref, bp1_ref)
    h = gmlp_block(h, w_in2_ref, b_in2_ref, wp2_ref, bp2_ref)
    out = linear(h, w_lat_ref, b_lat_ref)              # (TB, lat_pad) lane-dense
    o_ref[...] = out.astype(o_ref.dtype)


# ---------------------------------------------------------------------------
# Host-side weight prep (hoisted: run once per parameter set)
# ---------------------------------------------------------------------------

def prepare_weights(params, *, use_bf16=True):
    d_model = params["w_pre"].shape[1]
    latent_dim = params["w_lat"].shape[1]
    assert d_model % 2 == 0
    lat_pad = _round_up(latent_dim, 128)
    compute_dtype = jnp.bfloat16 if use_bf16 else jnp.float32

    # Pad pre-weight rows 125 -> 128 (matches the lane-aligned input pad),
    # fuse fc1||fc2 per block, pad the latent projection to a lane-dense width.
    w_pre = jnp.pad(params["w_pre"], ((0, 3), (0, 0)))
    b_pre = params["b_pre"]
    w_in1 = jnp.concatenate([params["w1_1"], params["wf2_1"]], axis=1)   # (d, 3d)
    b_in1 = jnp.concatenate([params["b1_1"], params["bf2_1"]], axis=1)   # (1, 3d)
    wp1, bp1 = params["wp_1"], params["bp_1"]
    w_in2 = jnp.concatenate([params["w1_2"], params["wf2_2"]], axis=1)
    b_in2 = jnp.concatenate([params["b1_2"], params["bf2_2"]], axis=1)
    wp2, bp2 = params["wp_2"], params["bp_2"]
    w_lat = jnp.pad(params["w_lat"], ((0, 0), (0, lat_pad - latent_dim)))
    b_lat = jnp.pad(params["b_lat"], ((0, 0), (0, lat_pad - latent_dim)))

    weights = [w_pre, b_pre,
               w_in1, b_in1, wp1, bp1,
               w_in2, b_in2, wp2, bp2,
               w_lat, b_lat]
    if use_bf16:
        # Cast matrices (not biases, which have leading dim 1) to bf16: halves
        # weight DMA traffic and hits the native MXU bf16 rate.
        weights = [w if w.shape[0] == 1 else w.astype(jnp.bfloat16)
                   for w in weights]
    weights = tuple(jax.device_put(w) for w in weights)

    meta = dict(d_model=d_model, latent_dim=latent_dim, lat_pad=lat_pad,
                compute_dtype=compute_dtype)
    return weights, meta


def _pick_tile_b(B):
    # Small batches: a single grid step (no 8-row MXU tiles, no extra per-step
    # overhead).  Only split once each tile would carry >= 256 rows.
    if B < 512:
        return _round_up(B, 8)
    n_steps = max(2, pl.cdiv(B, 1024))
    return min(1024, _round_up(pl.cdiv(B, n_steps), 8))


# ---------------------------------------------------------------------------
# Forward
# ---------------------------------------------------------------------------

def _encoder_forward(x, weights, meta, *, tile_b=None,
                     gelu_dtype=jnp.float32, use_tanh_gelu=False):
    B = x.shape[0]
    d_model = meta["d_model"]
    latent_dim = meta["latent_dim"]
    lat_pad = meta["lat_pad"]
    compute_dtype = meta["compute_dtype"]

    # nn.Flatten + lane alignment: pad K from 125 to 128 with zeros.
    x2 = x.reshape(B, -1).astype(jnp.float32)
    assert x2.shape[1] == 125, x2.shape
    x2 = jnp.pad(x2, ((0, 0), (0, 3)))
    if compute_dtype == jnp.bfloat16:
        x2 = x2.astype(jnp.bfloat16)

    if tile_b is None:
        tile_b = _pick_tile_b(B)
    B_pad = _round_up(B, tile_b)
    if B_pad != B:
        # Zero-padded rows produce garbage activations; they are sliced off
        # below and never reduced over inside the kernel.
        x2 = jnp.pad(x2, ((0, B_pad - B), (0, 0)))
    grid = (B_pad // tile_b,)

    def const_spec(arr):
        # Untiled, constant index map, single-buffered (never re-fetched).
        zeros = (0,) * arr.ndim
        return pl.BlockSpec(arr.shape, lambda i, _z=zeros: _z,
                            pipeline_mode=pl.Buffered(1))

    in_specs = [pl.BlockSpec((tile_b, 128), lambda i: (i, 0))]
    in_specs += [const_spec(w) for w in weights]
    out_spec = pl.BlockSpec((tile_b, lat_pad), lambda i: (i, 0))

    # VMEM limit derived from the actual footprint (+2x headroom), clamped so
    # it is comfortable on every generation incl. v7x's 64 MiB per-TC VMEM.
    x_bytes = 2 * tile_b * 128 * x2.dtype.itemsize          # double-buffered input
    out_bytes = 2 * tile_b * lat_pad * 4                    # double-buffered output
    w_bytes = sum(int(w.size) * w.dtype.itemsize for w in weights)
    act_bytes = tile_b * 8 * d_model * 4                    # in-kernel f32 intermediates
    vmem_limit = int(min(max(2 * (x_bytes + out_bytes + w_bytes + act_bytes),
                             16 << 20), 32 << 20))

    # Advisory cost estimate so XLA does not treat the custom call as free.
    d = d_model
    macs_per_sample = 128 * d + 2 * (d * 3 * d + d * d) + d * lat_pad
    cost = pl.CostEstimate(
        flops=2 * B_pad * macs_per_sample,
        transcendentals=B_pad * 3 * d,                      # pre + 2x gate GELUs
        bytes_accessed=w_bytes + B_pad * 128 * x2.dtype.itemsize
                       + B_pad * lat_pad * 4,
    )

    kernel = functools.partial(_encoder_kernel, d_model=d_model,
                               compute_dtype=compute_dtype,
                               gelu_dtype=gelu_dtype,
                               use_tanh_gelu=use_tanh_gelu)

    out = pl.pallas_call(
        kernel,
        out_shape=jax.ShapeDtypeStruct((B_pad, lat_pad), jnp.float32),
        grid_spec=pltpu.PrefetchScalarGridSpec(
            num_scalar_prefetch=0,
            grid=grid,
            in_specs=in_specs,
            out_specs=out_spec,
        ),
        compiler_params=pltpu.CompilerParams(
            dimension_semantics=("parallel",),
            vmem_limit_bytes=vmem_limit,
        ),
        cost_estimate=cost,
    )(x2, *weights)

    # Strip batch padding and the lane padding of the latent projection.
    return out[:B, :latent_dim]


def make_encoder(params, *, use_bf16=True, fast_gelu=False, tile_b=None):
    """Build a jitted forward with weight prep hoisted out of the call path.

    use_bf16:  bf16 MXU operands + f32 accumulation (default, fast).
               Set False for the exact-f32 matmul path.
    fast_gelu: tanh-approx GELU (EUP offload); gate chain in bf16 on v6e/v7x.
               Deviates slightly from PyTorch's exact (erf) nn.GELU.
    """
    weights, meta = prepare_weights(params, use_bf16=use_bf16)
    gen = _tpu_generation()
    if fast_gelu:
        use_tanh = True
        # v5e has no bf16 VPU/EUP -> keep the elementwise chain in f32 there.
        gelu_dtype = jnp.bfloat16 if (use_bf16 and gen >= 6) else jnp.float32
    else:
        use_tanh = False
        gelu_dtype = jnp.float32

    @jax.jit
    def fwd(x):
        return _encoder_forward(x, weights, meta, tile_b=tile_b,
                                gelu_dtype=gelu_dtype, use_tanh_gelu=use_tanh)

    return fwd


def gmlp_encoder_5x5x5(x, params, *, use_bf16=True, fast_gelu=False, tile_b=None):
    """Convenience one-shot entry point. Prefer make_encoder() for repeated use."""
    return make_encoder(params, use_bf16=use_bf16, fast_gelu=fast_gelu,
                        tile_b=tile_b)(x)


# ---------------------------------------------------------------------------
# Synthetic params + pure-JAX reference (validation)
# ---------------------------------------------------------------------------

def init_params(key, latent_dim=16, d_model=256):
    """Deterministic synthetic parameter init (shapes from the module __init__)."""
    ks = jax.random.split(key, 16)
    s = 0.02

    def lin(kw, kb, fan_in, fan_out):
        w = s * jax.random.normal(kw, (fan_in, fan_out), jnp.float32)
        b = s * jax.random.normal(kb, (1, fan_out), jnp.float32)
        return w, b

    p = {}
    p["w_pre"], p["b_pre"] = lin(ks[0], ks[1], 125, d_model)        # pre Linear(125, d)
    # block 1
    p["w1_1"], p["b1_1"] = lin(ks[2], ks[3], d_model, 2 * d_model)  # fc1
    p["wf2_1"], p["bf2_1"] = lin(ks[4], ks[5], d_model, d_model)    # fc2
    p["wp_1"], p["bp_1"] = lin(ks[6], ks[7], d_model, d_model)      # proj
    # block 2
    p["w1_2"], p["b1_2"] = lin(ks[8], ks[9], d_model, 2 * d_model)
    p["wf2_2"], p["bf2_2"] = lin(ks[10], ks[11], d_model, d_model)
    p["wp_2"], p["bp_2"] = lin(ks[12], ks[13], d_model, d_model)
    # bottleneck
    p["w_lat"], p["b_lat"] = lin(ks[14], ks[15], d_model, latent_dim)
    return p


def _reference_forward(x, p):
    """Pure-JAX reference of the PyTorch forward, for validation."""
    hp = jax.lax.Precision.HIGHEST

    def lin(a, w, b):
        return jnp.dot(a, w, precision=hp) + b

    def gelu(a):
        return 0.5 * a * (1.0 + jax.lax.erf(a / jnp.sqrt(2.0)))

    def block(h, w1, b1, wf2, bf2, wp, bp):
        uv = lin(h, w1, b1)
        d = h.shape[-1]
        u, v = uv[:, :d], uv[:, d:]
        return lin(gelu(u) * v, wp, bp) + lin(h, wf2, bf2)

    h = x.reshape(x.shape[0], -1)
    h = gelu(lin(h, p["w_pre"], p["b_pre"]))
    h = block(h, p["w1_1"], p["b1_1"], p["wf2_1"], p["bf2_1"], p["wp_1"], p["bp_1"])
    h = block(h, p["w1_2"], p["b1_2"], p["wf2_2"], p["bf2_2"], p["wp_2"], p["bp_2"])
    return lin(h, p["w_lat"], p["b_lat"])


if __name__ == "__main__":
    key = jax.random.PRNGKey(0)
    k_x, k_p = jax.random.split(key)

    B, LATENT, D_MODEL = 16, 16, 256
    x = jax.random.normal(k_x, (B, 1, 5, 5, 5), jnp.float32)
    params = init_params(k_p, latent_dim=LATENT, d_model=D_MODEL)

    ref = _reference_forward(x, params)

    # Default path: bf16 MXU operands, f32 accumulation, exact erf GELU in f32.
    enc = make_encoder(params)
    out = jax.block_until_ready(enc(x))
    assert out.shape == (B, LATENT), out.shape
    assert jnp.allclose(out, ref, atol=2e-2, rtol=2e-2), (
        float(jnp.max(jnp.abs(out - ref))))

    # Exact f32 matmul path (note: Mosaic's default f32 MXU path is not
    # bit-identical to the HIGHEST-precision reference; tolerance covers it).
    enc_f32 = make_encoder(params, use_bf16=False)
    out_f32 = jax.block_until_ready(enc_f32(x))
    assert jnp.allclose(out_f32, ref, atol=2e-3, rtol=2e-3), (
        float(jnp.max(jnp.abs(out_f32 - ref))))

    # fast_gelu path: tanh-approx GELU (EUP), bf16 gate chain on v6e/v7x only.
    enc_fast = make_encoder(params, fast_gelu=True)
    out_fast = jax.block_until_ready(enc_fast(x))
    assert jnp.allclose(out_fast, ref, atol=5e-2, rtol=5e-2), (
        float(jnp.max(jnp.abs(out_fast - ref))))

    # TODO(synk): optional fp8 weight storage for the DMA-bound small-B regime
    # on v7x was not implemented (accuracy trade-off not validated).

    print("KERNEL_OK")
</pallas_src>

<mosaic_0001>
module attributes {stable_mosaic.version = 11 : i64} {
  func.func @_encoder_kernel(%arg0: i32, %arg1: memref<16x128xbf16, #tpu.memory_space<vmem>>, %arg2: memref<128x256xbf16, #tpu.memory_space<vmem>>, %arg3: memref<1x256xf32, #tpu.memory_space<vmem>>, %arg4: memref<256x768xbf16, #tpu.memory_space<vmem>>, %arg5: memref<1x768xf32, #tpu.memory_space<vmem>>, %arg6: memref<256x256xbf16, #tpu.memory_space<vmem>>, %arg7: memref<1x256xf32, #tpu.memory_space<vmem>>, %arg8: memref<256x768xbf16, #tpu.memory_space<vmem>>, %arg9: memref<1x768xf32, #tpu.memory_space<vmem>>, %arg10: memref<256x256xbf16, #tpu.memory_space<vmem>>, %arg11: memref<1x256xf32, #tpu.memory_space<vmem>>, %arg12: memref<256x128xbf16, #tpu.memory_space<vmem>>, %arg13: memref<1x128xf32, #tpu.memory_space<vmem>>, %arg14: memref<16x128xf32, #tpu.memory_space<vmem>>) attributes {dimension_semantics = [#tpu.dimension_semantics<parallel>], iteration_bounds = array<i64: 1>, scalar_prefetch = 0 : i64, scratch_operands = 0 : i64, tpu.core_type = #tpu.core_type<tc>, window_params = [{transform_indices = @transform_0, window_bounds = array<i64: 16, 128>}, {pipeline_mode = #tpu.pipeline_mode<synchronous>, transform_indices = @transform_1, window_bounds = array<i64: 128, 256>}, {pipeline_mode = #tpu.pipeline_mode<synchronous>, transform_indices = @transform_2, window_bounds = array<i64: 1, 256>}, {pipeline_mode = #tpu.pipeline_mode<synchronous>, transform_indices = @transform_3, window_bounds = array<i64: 256, 768>}, {pipeline_mode = #tpu.pipeline_mode<synchronous>, transform_indices = @transform_4, window_bounds = array<i64: 1, 768>}, {pipeline_mode = #tpu.pipeline_mode<synchronous>, transform_indices = @transform_5, window_bounds = array<i64: 256, 256>}, {pipeline_mode = #tpu.pipeline_mode<synchronous>, transform_indices = @transform_6, window_bounds = array<i64: 1, 256>}, {pipeline_mode = #tpu.pipeline_mode<synchronous>, transform_indices = @transform_7, window_bounds = array<i64: 256, 768>}, {pipeline_mode = #tpu.pipeline_mode<synchronous>, transform_indices = @transform_8, window_bounds = array<i64: 1, 768>}, {pipeline_mode = #tpu.pipeline_mode<synchronous>, transform_indices = @transform_9, window_bounds = array<i64: 256, 256>}, {pipeline_mode = #tpu.pipeline_mode<synchronous>, transform_indices = @transform_10, window_bounds = array<i64: 1, 256>}, {pipeline_mode = #tpu.pipeline_mode<synchronous>, transform_indices = @transform_11, window_bounds = array<i64: 256, 128>}, {pipeline_mode = #tpu.pipeline_mode<synchronous>, transform_indices = @transform_12, window_bounds = array<i64: 1, 128>}, {transform_indices = @transform_13, window_bounds = array<i64: 16, 128>}]} {
    %c0 = arith.constant 0 : index
    %c0_0 = arith.constant 0 : index
    %0 = vector.load %arg1[%c0, %c0_0] : memref<16x128xbf16, #tpu.memory_space<vmem>>, vector<16x128xbf16>
    %c0_1 = arith.constant 0 : index
    %c0_2 = arith.constant 0 : index
    %1 = vector.load %arg2[%c0_1, %c0_2] : memref<128x256xbf16, #tpu.memory_space<vmem>>, vector<128x256xbf16>
    %cst = arith.constant dense<0.000000e+00> : vector<16x256xf32>
    %2 = tpu.matmul %0, %1, %cst {dimension_numbers = #tpu.dot_dimension_numbers<[1], [0], [0], [1], [0, 0, 1, 1], [], []>} : vector<16x128xbf16>, vector<128x256xbf16>, vector<16x256xf32> -> vector<16x256xf32>
    %c0_3 = arith.constant 0 : index
    %c0_4 = arith.constant 0 : index
    %3 = vector.load %arg3[%c0_3, %c0_4] : memref<1x256xf32, #tpu.memory_space<vmem>>, vector<1x256xf32>
    %4 = vector.broadcast %3 : vector<1x256xf32> to vector<16x256xf32>
    %5 = arith.addf %2, %4 : vector<16x256xf32>
    %cst_5 = arith.constant 5.000000e-01 : f32
    %6 = vector.broadcast %cst_5 : f32 to vector<16x256xf32>
    %7 = arith.mulf %6, %5 : vector<16x256xf32>
    %cst_6 = arith.constant 0.707106769 : f32
    %8 = vector.broadcast %cst_6 : f32 to vector<16x256xf32>
    %9 = arith.mulf %5, %8 : vector<16x256xf32>
    %10 = math.erf %9 : vector<16x256xf32>
    %cst_7 = arith.constant 1.000000e+00 : f32
    %11 = vector.broadcast %cst_7 : f32 to vector<16x256xf32>
    %12 = arith.addf %11, %10 : vector<16x256xf32>
    %13 = arith.mulf %7, %12 : vector<16x256xf32>
    %14 = arith.truncf %13 : vector<16x256xf32> to vector<16x256xbf16>
    %c0_8 = arith.constant 0 : index
    %c0_9 = arith.constant 0 : index
    %15 = vector.load %arg4[%c0_8, %c0_9] : memref<256x768xbf16, #tpu.memory_space<vmem>>, vector<256x768xbf16>
    %cst_10 = arith.constant dense<0.000000e+00> : vector<16x768xf32>
    %16 = tpu.matmul %14, %15, %cst_10 {dimension_numbers = #tpu.dot_dimension_numbers<[1], [0], [0], [1], [0, 0, 1, 1], [], []>} : vector<16x256xbf16>, vector<256x768xbf16>, vector<16x768xf32> -> vector<16x768xf32>
    %c0_11 = arith.constant 0 : index
    %c0_12 = arith.constant 0 : index
    %17 = vector.load %arg5[%c0_11, %c0_12] : memref<1x768xf32, #tpu.memory_space<vmem>>, vector<1x768xf32>
    %18 = vector.broadcast %17 : vector<1x768xf32> to vector<16x768xf32>
    %19 = arith.addf %16, %18 : vector<16x768xf32>
    %20 = vector.extract_strided_slice %19 {offsets = [0, 0], sizes = [16, 256], strides = [1, 1]} : vector<16x768xf32> to vector<16x256xf32>
    %21 = vector.extract_strided_slice %19 {offsets = [0, 256], sizes = [16, 256], strides = [1, 1]} : vector<16x768xf32> to vector<16x256xf32>
    %22 = vector.extract_strided_slice %19 {offsets = [0, 512], sizes = [16, 256], strides = [1, 1]} : vector<16x768xf32> to vector<16x256xf32>
    %cst_13 = arith.constant 5.000000e-01 : f32
    %23 = vector.broadcast %cst_13 : f32 to vector<16x256xf32>
    %24 = arith.mulf %23, %20 : vector<16x256xf32>
    %cst_14 = arith.constant 0.707106769 : f32
    %25 = vector.broadcast %cst_14 : f32 to vector<16x256xf32>
    %26 = arith.mulf %20, %25 : vector<16x256xf32>
    %27 = math.erf %26 : vector<16x256xf32>
    %cst_15 = arith.constant 1.000000e+00 : f32
    %28 = vector.broadcast %cst_15 : f32 to vector<16x256xf32>
    %29 = arith.addf %28, %27 : vector<16x256xf32>
    %30 = arith.mulf %24, %29 : vector<16x256xf32>
    %31 = arith.mulf %30, %21 : vector<16x256xf32>
    %32 = arith.truncf %31 : vector<16x256xf32> to vector<16x256xbf16>
    %c0_16 = arith.constant 0 : index
    %c0_17 = arith.constant 0 : index
    %33 = vector.load %arg6[%c0_16, %c0_17] : memref<256x256xbf16, #tpu.memory_space<vmem>>, vector<256x256xbf16>
    %cst_18 = arith.constant dense<0.000000e+00> : vector<16x256xf32>
    %34 = tpu.matmul %32, %33, %cst_18 {dimension_numbers = #tpu.dot_dimension_numbers<[1], [0], [0], [1], [0, 0, 1, 1], [], []>} : vector<16x256xbf16>, vector<256x256xbf16>, vector<16x256xf32> -> vector<16x256xf32>
    %c0_19 = arith.constant 0 : index
    %c0_20 = arith.constant 0 : index
    %35 = vector.load %arg7[%c0_19, %c0_20] : memref<1x256xf32, #tpu.memory_space<vmem>>, vector<1x256xf32>
    %36 = vector.broadcast %35 : vector<1x256xf32> to vector<16x256xf32>
    %37 = arith.addf %34, %36 : vector<16x256xf32>
    %38 = arith.addf %37, %22 : vector<16x256xf32>
    %39 = arith.truncf %38 : vector<16x256xf32> to vector<16x256xbf16>
    %c0_21 = arith.constant 0 : index
    %c0_22 = arith.constant 0 : index
    %40 = vector.load %arg8[%c0_21, %c0_22] : memref<256x768xbf16, #tpu.memory_space<vmem>>, vector<256x768xbf16>
    %cst_23 = arith.constant dense<0.000000e+00> : vector<16x768xf32>
    %41 = tpu.matmul %39, %40, %cst_23 {dimension_numbers = #tpu.dot_dimension_numbers<[1], [0], [0], [1], [0, 0, 1, 1], [], []>} : vector<16x256xbf16>, vector<256x768xbf16>, vector<16x768xf32> -> vector<16x768xf32>
    %c0_24 = arith.constant 0 : index
    %c0_25 = arith.constant 0 : index
    %42 = vector.load %arg9[%c0_24, %c0_25] : memref<1x768xf32, #tpu.memory_space<vmem>>, vector<1x768xf32>
    %43 = vector.broadcast %42 : vector<1x768xf32> to vector<16x768xf32>
    %44 = arith.addf %41, %43 : vector<16x768xf32>
    %45 = vector.extract_strided_slice %44 {offsets = [0, 0], sizes = [16, 256], strides = [1, 1]} : vector<16x768xf32> to vector<16x256xf32>
    %46 = vector.extract_strided_slice %44 {offsets = [0, 256], sizes = [16, 256], strides = [1, 1]} : vector<16x768xf32> to vector<16x256xf32>
    %47 = vector.extract_strided_slice %44 {offsets = [0, 512], sizes = [16, 256], strides = [1, 1]} : vector<16x768xf32> to vector<16x256xf32>
    %cst_26 = arith.constant 5.000000e-01 : f32
    %48 = vector.broadcast %cst_26 : f32 to vector<16x256xf32>
    %49 = arith.mulf %48, %45 : vector<16x256xf32>
    %cst_27 = arith.constant 0.707106769 : f32
    %50 = vector.broadcast %cst_27 : f32 to vector<16x256xf32>
    %51 = arith.mulf %45, %50 : vector<16x256xf32>
    %52 = math.erf %51 : vector<16x256xf32>
    %cst_28 = arith.constant 1.000000e+00 : f32
    %53 = vector.broadcast %cst_28 : f32 to vector<16x256xf32>
    %54 = arith.addf %53, %52 : vector<16x256xf32>
    %55 = arith.mulf %49, %54 : vector<16x256xf32>
    %56 = arith.mulf %55, %46 : vector<16x256xf32>
    %57 = arith.truncf %56 : vector<16x256xf32> to vector<16x256xbf16>
    %c0_29 = arith.constant 0 : index
    %c0_30 = arith.constant 0 : index
    %58 = vector.load %arg10[%c0_29, %c0_30] : memref<256x256xbf16, #tpu.memory_space<vmem>>, vector<256x256xbf16>
    %cst_31 = arith.constant dense<0.000000e+00> : vector<16x256xf32>
    %59 = tpu.matmul %57, %58, %cst_31 {dimension_numbers = #tpu.dot_dimension_numbers<[1], [0], [0], [1], [0, 0, 1, 1], [], []>} : vector<16x256xbf16>, vector<256x256xbf16>, vector<16x256xf32> -> vector<16x256xf32>
    %c0_32 = arith.constant 0 : index
    %c0_33 = arith.constant 0 : index
    %60 = vector.load %arg11[%c0_32, %c0_33] : memref<1x256xf32, #tpu.memory_space<vmem>>, vector<1x256xf32>
    %61 = vector.broadcast %60 : vector<1x256xf32> to vector<16x256xf32>
    %62 = arith.addf %59, %61 : vector<16x256xf32>
    %63 = arith.addf %62, %47 : vector<16x256xf32>
    %64 = arith.truncf %63 : vector<16x256xf32> to vector<16x256xbf16>
    %c0_34 = arith.constant 0 : index
    %c0_35 = arith.constant 0 : index
    %65 = vector.load %arg12[%c0_34, %c0_35] : memref<256x128xbf16, #tpu.memory_space<vmem>>, vector<256x128xbf16>
    %cst_36 = arith.constant dense<0.000000e+00> : vector<16x128xf32>
    %66 = tpu.matmul %64, %65, %cst_36 {dimension_numbers = #tpu.dot_dimension_numbers<[1], [0], [0], [1], [0, 0, 1, 1], [], []>} : vector<16x256xbf16>, vector<256x128xbf16>, vector<16x128xf32> -> vector<16x128xf32>
    %c0_37 = arith.constant 0 : index
    %c0_38 = arith.constant 0 : index
    %67 = vector.load %arg13[%c0_37, %c0_38] : memref<1x128xf32, #tpu.memory_space<vmem>>, vector<1x128xf32>
    %68 = vector.broadcast %67 : vector<1x128xf32> to vector<16x128xf32>
    %69 = arith.addf %66, %68 : vector<16x128xf32>
    %c0_39 = arith.constant 0 : index
    %c0_40 = arith.constant 0 : index
    %70 = vector.load %arg14[%c0_39, %c0_40] : memref<16x128xf32, #tpu.memory_space<vmem>>, vector<16x128xf32>
    tpu.vector_store %arg14[%c0_39, %c0_40], %69 {strides = array<i32>} : memref<16x128xf32, #tpu.memory_space<vmem>>, vector<16x128xf32>,
    return
  }
  func.func @transform_0(%arg0: i32) -> (i32, i32) {
    %c0_i32 = arith.constant 0 : i32
    %c0_i32_0 = arith.constant 0 : i32
    return %arg0, %c0_i32 : i32, i32
  }
  func.func @transform_1(%arg0: i32) -> (i32, i32) {
    %c0_i32 = arith.constant 0 : i32
    %c0_i32_0 = arith.constant 0 : i32
    %c0_i32_1 = arith.constant 0 : i32
    return %c0_i32, %c0_i32_0 : i32, i32
  }
  func.func @transform_2(%arg0: i32) -> (i32, i32) {
    %c0_i32 = arith.constant 0 : i32
    %c0_i32_0 = arith.constant 0 : i32
    %c0_i32_1 = arith.constant 0 : i32
    return %c0_i32, %c0_i32_0 : i32, i32
  }
  func.func @transform_3(%arg0: i32) -> (i32, i32) {
    %c0_i32 = arith.constant 0 : i32
    %c0_i32_0 = arith.constant 0 : i32
    %c0_i32_1 = arith.constant 0 : i32
    return %c0_i32, %c0_i32_0 : i32, i32
  }
  func.func @transform_4(%arg0: i32) -> (i32, i32) {
    %c0_i32 = arith.constant 0 : i32
    %c0_i32_0 = arith.constant 0 : i32
    %c0_i32_1 = arith.constant 0 : i32
    return %c0_i32, %c0_i32_0 : i32, i32
  }
  func.func @transform_5(%arg0: i32) -> (i32, i32) {
    %c0_i32 = arith.constant 0 : i32
    %c0_i32_0 = arith.constant 0 : i32
    %c0_i32_1 = arith.constant 0 : i32
    return %c0_i32, %c0_i32_0 : i32, i32
  }
  func.func @transform_6(%arg0: i32) -> (i32, i32) {
    %c0_i32 = arith.constant 0 : i32
    %c0_i32_0 = arith.constant 0 : i32
    %c0_i32_1 = arith.constant 0 : i32
    return %c0_i32, %c0_i32_0 : i32, i32
  }
  func.func @transform_7(%arg0: i32) -> (i32, i32) {
    %c0_i32 = arith.constant 0 : i32
    %c0_i32_0 = arith.constant 0 : i32
    %c0_i32_1 = arith.constant 0 : i32
    return %c0_i32, %c0_i32_0 : i32, i32
  }
  func.func @transform_8(%arg0: i32) -> (i32, i32) {
    %c0_i32 = arith.constant 0 : i32
    %c0_i32_0 = arith.constant 0 : i32
    %c0_i32_1 = arith.constant 0 : i32
    return %c0_i32, %c0_i32_0 : i32, i32
  }
  func.func @transform_9(%arg0: i32) -> (i32, i32) {
    %c0_i32 = arith.constant 0 : i32
    %c0_i32_0 = arith.constant 0 : i32
    %c0_i32_1 = arith.constant 0 : i32
    return %c0_i32, %c0_i32_0 : i32, i32
  }
  func.func @transform_10(%arg0: i32) -> (i32, i32) {
    %c0_i32 = arith.constant 0 : i32
    %c0_i32_0 = arith.constant 0 : i32
    %c0_i32_1 = arith.constant 0 : i32
    return %c0_i32, %c0_i32_0 : i32, i32
  }
  func.func @transform_11(%arg0: i32) -> (i32, i32) {
    %c0_i32 = arith.constant 0 : i32
    %c0_i32_0 = arith.constant 0 : i32
    %c0_i32_1 = arith.constant 0 : i32
    return %c0_i32, %c0_i32_0 : i32, i32
  }
  func.func @transform_12(%arg0: i32) -> (i32, i32) {
    %c0_i32 = arith.constant 0 : i32
    %c0_i32_0 = arith.constant 0 : i32
    %c0_i32_1 = arith.constant 0 : i32
    return %c0_i32, %c0_i32_0 : i32, i32
  }
  func.func @transform_13(%arg0: i32) -> (i32, i32) {
    %c0_i32 = arith.constant 0 : i32
    %c0_i32_0 = arith.constant 0 : i32
    return %arg0, %c0_i32 : i32, i32
  }
}

</mosaic_0001>

<bundles_post_ra>
// kernel: fwd.1
= control target key start
LH: loop header
LB: loop body
LE: loop exit
PB: predicated region body
PF: predicated region fallthrough
CT: control target
= control target key end

     0   :  { %v3266_v2 = vmov 0   ;;  %s4293_s0 = inlined_call_operand.vmem [shape: bf16[16,128], index: 0, kind: input, shape index: {}]   ;;  %s4294_s1 = inlined_call_operand.vmem [shape: bf16[128,256], index: 1, kind: input, shape index: {}]   ;;  %s4295_s2 = inlined_call_operand.vmem [shape: f32[1,256], index: 2, kind: input, shape index: {}]   ;;  %s4296_s3 = inlined_call_operand.vmem [shape: bf16[256,768], index: 3, kind: input, shape index: {}]   ;;  %s4297_s4 = inlined_call_operand.vmem [shape: f32[1,768], index: 4, kind: input, shape index: {}]   ;;  %s4298_s5 = inlined_call_operand.vmem [shape: bf16[256,256], index: 5, kind: input, shape index: {}]   ;;  %s4299_s6 = inlined_call_operand.vmem [shape: f32[1,256], index: 6, kind: input, shape index: {}]   ;;  %s4300_s7 = inlined_call_operand.vmem [shape: bf16[256,768], index: 7, kind: input, shape index: {}]   ;;  %s4301_s8 = inlined_call_operand.vmem [shape: f32[1,768], index: 8, kind: input, shape index: {}]   ;;  %s4302_s9 = inlined_call_operand.vmem [shape: bf16[256,256], index: 9, kind: input, shape index: {}]   ;;  %s4303_s10 = inlined_call_operand.vmem [shape: f32[1,256], index: 10, kind: input, shape index: {}]   ;;  %s4304_s11 = inlined_call_operand.vmem [shape: bf16[256,128], index: 11, kind: input, shape index: {}]   ;;  %s4305_s12 = inlined_call_operand.vmem [shape: f32[1,128], index: 12, kind: input, shape index: {}]   ;;  %s4306_s13 = inlined_call_operand.hbm [shape: f32[16,128], index: 13, kind: output, shape index: {}]  }
   0x1   :  { %v2793_v0 = vld [vmem:[%s4294_s1 + $0x4] ss:$8 sps:$4 sm:$0xff]   ;;  %v2795_v1 = vld [vmem:[%s4294_s1] ss:$8 sps:$4 sm:$0xff]   ;;  %194 = vmatprep.mubr.bf16.mxu0 %v3266_v2  ;;  %v2796_v3 = vld [vmem:[%s4294_s1 + $0x14] ss:$8 sps:$4 sm:$0xff]  }
   0x2   :  { %162 = vmatprep.subr.bf16.mxu0 %v2793_v0  ;;  %v2798_v4 = vld [vmem:[%s4294_s1 + $0x10] ss:$8 sps:$4 sm:$0xff]   ;;  %v2799_v5 = vld [vmem:[%s4294_s1 + $0x24] ss:$8 sps:$4 sm:$0xff]   ;;  %v2801_v6 = vld [vmem:[%s4294_s1 + $0x20] ss:$8 sps:$4 sm:$0xff]  }
   0x3   :  { %163 = vmatpush1.bf16.msra.mxu0 %v2795_v1  ;;  %v2802_v7 = vld [vmem:[%s4294_s1 + $0x34] ss:$8 sps:$4 sm:$0xff]   ;;  %v2804_v8 = vld [vmem:[%s4294_s1 + $0x30] ss:$8 sps:$4 sm:$0xff]   ;;  %v2805_v9 = vld [vmem:[%s4294_s1 + $0x44] ss:$8 sps:$4 sm:$0xff]  }
   0x4   :  { %164 = vmatprep.subr.bf16.mxu0 %v2796_v3  ;;  %v2818_v10 = vld [vmem:[%s4296_s3 + $0x4] ss:$24 sps:$4 sm:$0xff]   ;;  %v2820_v11 = vld [vmem:[%s4296_s3] ss:$24 sps:$4 sm:$0xff]   ;;  %v2824_v13 = vld [vmem:[%s4296_s3 + $0x34] ss:$24 sps:$4 sm:$0xff]  }
   0x5   :  { %v2807_v12 = vld [vmem:[%s4294_s1 + $0x40] ss:$8 sps:$4 sm:$0xff]   ;;  %835 = vmatprep.subr.bf16.mxu1 %v2818_v10  ;;  %v2808_v15 = vld [vmem:[%s4294_s1 + $0x54] ss:$8 sps:$4 sm:$0xff]   ;;  %v2810_v17 = vld [vmem:[%s4294_s1 + $0x50] ss:$8 sps:$4 sm:$0xff]  }
   0x6   :  { %836 = vmatpush1.bf16.msra.mxu1 %v2820_v11  ;;  %v2826_v14 = vld [vmem:[%s4296_s3 + $0x30] ss:$24 sps:$4 sm:$0xff]   ;;  %v2830_v16 = vld [vmem:[%s4296_s3 + $0x64] ss:$24 sps:$4 sm:$0xff]   ;;  %v2832_v18 = vld [vmem:[%s4296_s3 + $0x60] ss:$24 sps:$4 sm:$0xff]  }
   0x7   :  { %165 = vmatpush1.bf16.msra.mxu0 %v2798_v4  ;;  %837 = vmatprep.subr.bf16.mxu1 %v2824_v13  ;;  %v2811_v19 = vld [vmem:[%s4294_s1 + $0x64] ss:$8 sps:$4 sm:$0xff]   ;;  %v2813_v21 = vld [vmem:[%s4294_s1 + $0x60] ss:$8 sps:$4 sm:$0xff]   ;;  %v2814_v23 = vld [vmem:[%s4294_s1 + $0x74] ss:$8 sps:$4 sm:$0xff]  }
   0x8   :  { %166 = vmatprep.subr.bf16.mxu0 %v2799_v5  ;;  %v2836_v20 = vld [vmem:[%s4296_s3 + $0x94] ss:$24 sps:$4 sm:$0xff]   ;;  %v2838_v22 = vld [vmem:[%s4296_s3 + $0x90] ss:$24 sps:$4 sm:$0xff]   ;;  %v2842_v24 = vld [vmem:[%s4296_s3 + $0xc4] ss:$24 sps:$4 sm:$0xff]  }
   0x9   :  { %v2816_v25 = vld [vmem:[%s4294_s1 + $0x70] ss:$8 sps:$4 sm:$0xff]   ;;  %v2823_v27 = vld [vmem:[%s4296_s3 + $0xc] ss:$24 sps:$4 sm:$0xff]   ;;  %v2821_v30 = vld [vmem:[%s4296_s3 + $0x8] ss:$24 sps:$4 sm:$0xff]  }
   0xa   :  { %838 = vmatpush1.bf16.msra.mxu1 %v2826_v14  ;;  %v2844_v26 = vld [vmem:[%s4296_s3 + $0xc0] ss:$24 sps:$4 sm:$0xff]   ;;  %v2848_v28 = vld [vmem:[%s4296_s3 + $0xf4] ss:$24 sps:$4 sm:$0xff]   ;;  %v2850_v31 = vld [vmem:[%s4296_s3 + $0xf0] ss:$24 sps:$4 sm:$0xff]  }
   0xb   :  { %167 = vmatpush1.bf16.msra.mxu0 %v2801_v6  ;;  %839 = vmatprep.subr.bf16.mxu1 %v2830_v16  ;;  %v2817_v29 = vld [vmem:[%s4293_s0] sm:$0xff]   ;;  %v2829_v32 = vld [vmem:[%s4296_s3 + $0x3c] ss:$24 sps:$4 sm:$0xff]   ;;  %v2827_v34 = vld [vmem:[%s4296_s3 + $0x38] ss:$24 sps:$4 sm:$0xff]  }
   0xc   :  { %168 = vmatprep.subr.bf16.mxu0 %v2802_v7  ;;  %v2854_v33 = vld [vmem:[%s4296_s3 + $0x124] ss:$24 sps:$4 sm:$0xff]   ;;  %v2856_v35 = vld [vmem:[%s4296_s3 + $0x120] ss:$24 sps:$4 sm:$0xff]   ;;  %v2860_v37 = vld [vmem:[%s4296_s3 + $0x154] ss:$24 sps:$4 sm:$0xff]  }
   0xd   :  { %v2835_v36 = vld [vmem:[%s4296_s3 + $0x6c] ss:$24 sps:$4 sm:$0xff]   ;;  %v2833_v38 = vld [vmem:[%s4296_s3 + $0x68] ss:$24 sps:$4 sm:$0xff]   ;;  %v2841_v39 = vld [vmem:[%s4296_s3 + $0x9c] ss:$24 sps:$4 sm:$0xff]  }
   0xe   :  { %840 = vmatpush1.bf16.msra.mxu1 %v2832_v18  ;;  %v2862_v40 = vld [vmem:[%s4296_s3 + $0x150] ss:$24 sps:$4 sm:$0xff]   ;;  %v2866_v41 = vld [vmem:[%s4296_s3 + $0x184] ss:$24 sps:$4 sm:$0xff]   ;;  %v2868_v43 = vld [vmem:[%s4296_s3 + $0x180] ss:$24 sps:$4 sm:$0xff]  }
   0xf   :  { %169 = vmatpush1.bf16.msra.mxu0 %v2804_v8  ;;  %841 = vmatprep.subr.bf16.mxu1 %v2836_v20  ;;  %v2839_v42 = vld [vmem:[%s4296_s3 + $0x98] ss:$24 sps:$4 sm:$0xff]   ;;  %v2847_v44 = vld [vmem:[%s4296_s3 + $0xcc] ss:$24 sps:$4 sm:$0xff]   ;;  %v2845_v46 = vld [vmem:[%s4296_s3 + $0xc8] ss:$24 sps:$4 sm:$0xff]  }
  0x10   :  { %170 = vmatprep.subr.bf16.mxu0 %v2805_v9  ;;  %v2872_v45 = vld [vmem:[%s4296_s3 + $0x1b4] ss:$24 sps:$4 sm:$0xff]   ;;  %v2874_v47 = vld [vmem:[%s4296_s3 + $0x1b0] ss:$24 sps:$4 sm:$0xff]   ;;  %v2878_v58 = vld [vmem:[%s4296_s3 + $0x1e4] ss:$24 sps:$4 sm:$0xff]  }
  0x11   :  { %v2853_v48 = vld [vmem:[%s4296_s3 + $0xfc] ss:$24 sps:$4 sm:$0xff]   ;;  %v2851_v49 = vld [vmem:[%s4296_s3 + $0xf8] ss:$24 sps:$4 sm:$0xff]   ;;  %v2859_v50 = vld [vmem:[%s4296_s3 + $0x12c] ss:$24 sps:$4 sm:$0xff]  }
  0x12   :  { %842 = vmatpush1.bf16.msra.mxu1 %v2838_v22  ;;  %v2857_v51 = vld [vmem:[%s4296_s3 + $0x128] ss:$24 sps:$4 sm:$0xff]   ;;  %v2865_v52 = vld [vmem:[%s4296_s3 + $0x15c] ss:$24 sps:$4 sm:$0xff]   ;;  %v2863_v53 = vld [vmem:[%s4296_s3 + $0x158] ss:$24 sps:$4 sm:$0xff]  }
  0x13   :  { %171 = vmatpush1.bf16.msra.mxu0 %v2807_v12  ;;  %843 = vmatprep.subr.bf16.mxu1 %v2842_v24  ;;  %v2871_v54 = vld [vmem:[%s4296_s3 + $0x18c] ss:$24 sps:$4 sm:$0xff]   ;;  %v2869_v55 = vld [vmem:[%s4296_s3 + $0x188] ss:$24 sps:$4 sm:$0xff]   ;;  %v2877_v56 = vld [vmem:[%s4296_s3 + $0x1bc] ss:$24 sps:$4 sm:$0xff]  }
  0x14   :  { %172 = vmatprep.subr.bf16.mxu0 %v2808_v15  ;;  %v2875_v57 = vld [vmem:[%s4296_s3 + $0x1b8] ss:$24 sps:$4 sm:$0xff]   ;;  %v2883_v60 = vld [vmem:[%s4296_s3 + $0x1ec] ss:$24 sps:$4 sm:$0xff]   ;;  %v2881_v61 = vld [vmem:[%s4296_s3 + $0x1e8] ss:$24 sps:$4 sm:$0xff]  }
  0x15   :  { %v2880_v59 = vld [vmem:[%s4296_s3 + $0x1e0] ss:$24 sps:$4 sm:$0xff]   ;;  %v2884_v62 = vld [vmem:[%s4296_s3 + $0x214] ss:$24 sps:$4 sm:$0xff]   ;;  %v2886_v63 = vld [vmem:[%s4296_s3 + $0x210] ss:$24 sps:$4 sm:$0xff]  }
  0x16   :  { %844 = vmatpush1.bf16.msra.mxu1 %v2844_v26  ;;  %v2889_v0 = vld [vmem:[%s4296_s3 + $0x21c] ss:$24 sps:$4 sm:$0xff]   ;;  %v2887_v1 = vld [vmem:[%s4296_s3 + $0x218] ss:$24 sps:$4 sm:$0xff]  }
  0x17   :  { %173 = vmatpush1.bf16.msra.mxu0 %v2810_v17  ;;  %845 = vmatprep.subr.bf16.mxu1 %v2848_v28  ;;  %v2890_v2 = vld [vmem:[%s4296_s3 + $0x244] ss:$24 sps:$4 sm:$0xff]  }
  0x18   :  { %174 = vmatprep.subr.bf16.mxu0 %v2811_v19 }
  0x1a   :  { %846 = vmatpush1.bf16.msra.mxu1 %v2850_v31 }
  0x1b   :  { %175 = vmatpush1.bf16.msra.mxu0 %v2813_v21  ;;  %847 = vmatprep.subr.bf16.mxu1 %v2854_v33 }
  0x1c   :  { %176 = vmatprep.subr.bf16.mxu0 %v2814_v23 }
  0x1e   :  { %848 = vmatpush1.bf16.msra.mxu1 %v2856_v35 }
  0x1f   :  { %177 = vmatpush1.bf16.msra.mxu0 %v2816_v25  ;;  %849 = vmatprep.subr.bf16.mxu1 %v2860_v37 }
  0x20   :  { %878 = vmatprep.subr.bf16.mxu0 %v2823_v27 }
  0x22   :  { %195 = vmatmul.mubr.bf16.vlgmr.msra.gmra.mrb[0].mxu0 %v2817_v29  ;;  %850 = vmatpush1.bf16.msra.mxu1 %v2862_v40 }
  0x23   :  { %879 = vmatpush1.bf16.msra.mxu0 %v2821_v30  ;;  %851 = vmatprep.subr.bf16.mxu1 %v2866_v41 }
  0x24   :  { %880 = vmatprep.subr.bf16.mxu0 %v2829_v32 }
  0x26   :  { %852 = vmatpush1.bf16.msra.mxu1 %v2868_v43 }
  0x27   :  { %881 = vmatpush1.bf16.msra.mxu0 %v2827_v34  ;;  %853 = vmatprep.subr.bf16.mxu1 %v2872_v45 }
  0x28   :  { %882 = vmatprep.subr.bf16.mxu0 %v2835_v36 }
  0x2a   :  { %854 = vmatpush1.bf16.msra.mxu1 %v2874_v47 }
  0x2b   :  { %883 = vmatpush1.bf16.msra.mxu0 %v2833_v38  ;;  %855 = vmatprep.subr.bf16.mxu1 %v2878_v58 }
  0x2c   :  { %884 = vmatprep.subr.bf16.mxu0 %v2841_v39 }
  0x2e   :  { %856 = vmatpush1.bf16.msra.mxu1 %v2880_v59 }
  0x2f   :  { %885 = vmatpush1.bf16.msra.mxu0 %v2839_v42  ;;  %857 = vmatprep.subr.bf16.mxu1 %v2884_v62 }
  0x30   :  { %886 = vmatprep.subr.bf16.mxu0 %v2847_v44 }
  0x32   :  { %858 = vmatpush1.bf16.msra.mxu1 %v2886_v63 }
  0x33   :  { %887 = vmatpush1.bf16.msra.mxu0 %v2845_v46 }
  0x34   :  { %888 = vmatprep.subr.bf16.mxu0 %v2853_v48 }
  0x37   :  { %889 = vmatpush1.bf16.msra.mxu0 %v2851_v49 }
  0x38   :  { %890 = vmatprep.subr.bf16.mxu0 %v2859_v50 }
  0x3b   :  { %891 = vmatpush1.bf16.msra.mxu0 %v2857_v51 }
  0x3c   :  { %892 = vmatprep.subr.bf16.mxu0 %v2865_v52 }
  0x3f   :  { %893 = vmatpush1.bf16.msra.mxu0 %v2863_v53 }
  0x40   :  { %894 = vmatprep.subr.bf16.mxu0 %v2871_v54 }
  0x43   :  { %895 = vmatpush1.bf16.msra.mxu0 %v2869_v55 }
  0x44   :  { %896 = vmatprep.subr.bf16.mxu0 %v2877_v56 }
  0x47   :  { %897 = vmatpush1.bf16.msra.mxu0 %v2875_v57 }
  0x48   :  { %898 = vmatprep.subr.bf16.mxu0 %v2883_v60 }
  0x4b   :  { %899 = vmatpush1.bf16.msra.mxu0 %v2881_v61 }
  0x4c   :  { %900 = vmatprep.subr.bf16.mxu0 %v2889_v0 }
  0x4f   :  { %901 = vmatpush1.bf16.msra.mxu0 %v2887_v1 }
  0x50   :  { %18 = vsyncpa [#allocation3], 0  ;;  %v2892_v3 = vld [vmem:[%s4296_s3 + $0x240] ss:$24 sps:$4 sm:$0xff]   ;;  %v2895_v4 = vld [vmem:[%s4296_s3 + $0x24c] ss:$24 sps:$4 sm:$0xff]   ;;  %859 = vmatprep.subr.bf16.mxu1 %v2890_v2  ;;  %v66_v19 = vlaneseq }
  0x51   :  { %v2893_v5 = vld [vmem:[%s4296_s3 + $0x248] ss:$24 sps:$4 sm:$0xff]   ;;  %860 = vmatpush1.bf16.msra.mxu1 %v2892_v3  ;;  %902 = vmatprep.subr.bf16.mxu0 %v2895_v4  ;;  %v2896_v6 = vld [vmem:[%s4296_s3 + $0x274] ss:$24 sps:$4 sm:$0xff]   ;;  %v2899_v9 = vld [vmem:[%s4296_s3 + $0x278] ss:$24 sps:$4 sm:$0xff]  }
  0x52   :  { %v2898_v7 = vld [vmem:[%s4296_s3 + $0x270] ss:$24 sps:$4 sm:$0xff]   ;;  %v2901_v8 = vld [vmem:[%s4296_s3 + $0x27c] ss:$24 sps:$4 sm:$0xff]   ;;  %861 = vmatprep.subr.bf16.mxu1 %v2896_v6  ;;  %v2904_v11 = vld [vmem:[%s4296_s3 + $0x2a0] ss:$24 sps:$4 sm:$0xff]  }
  0x53   :  { %903 = vmatpush1.bf16.msra.mxu0 %v2893_v5  ;;  %v2902_v10 = vld [vmem:[%s4296_s3 + $0x2a4] ss:$24 sps:$4 sm:$0xff]   ;;  %v2905_v13 = vld [vmem:[%s4296_s3 + $0x2a8] ss:$24 sps:$4 sm:$0xff]   ;;  %v2908_v14 = vld [vmem:[%s4296_s3 + $0x2d4] ss:$24 sps:$4 sm:$0xff]  }
  0x54   :  { %904 = vmatprep.subr.bf16.mxu0 %v2901_v8  ;;  %v2907_v12 = vld [vmem:[%s4296_s3 + $0x2ac] ss:$24 sps:$4 sm:$0xff]   ;;  %v2910_v15 = vld [vmem:[%s4296_s3 + $0x2d0] ss:$24 sps:$4 sm:$0xff]   ;;  %v2913_v16 = vld [vmem:[%s4296_s3 + $0x2dc] ss:$24 sps:$4 sm:$0xff]  }
  0x55   :  { %862 = vmatpush1.bf16.msra.mxu1 %v2898_v7  ;;  %v2911_v17 = vld [vmem:[%s4296_s3 + $0x2d8] ss:$24 sps:$4 sm:$0xff]   ;;  %v2916_v18 = vld [vmem:[%s4296_s3 + $0x14] ss:$24 sps:$4 sm:$0xff]   ;;  %v3586_v20 = vshrl.u32 %v66_v19, 7  ;;  %s3267_s17 = smov [#allocation2]  }
  0x56   :  { %863 = vmatprep.subr.bf16.mxu1 %v2902_v10  ;;  %v64_v22 = vld [vmem:[%s4295_s2] sm:$0x3]  ;;  %v2914_v56 = vld [vmem:[%s4296_s3 + $0x10] ss:$24 sps:$4 sm:$0xff]   ;;  %v2919_v57 = vld [vmem:[%s4296_s3 + $0x44] ss:$24 sps:$4 sm:$0xff]  }
  0x57   :  { %905 = vmatpush1.bf16.msra.mxu0 %v2899_v9  ;;  %v3589_v21 = vsub.s32 0, %v3586_v20  ;;  %v3595_v23 = vsub.s32 1, %v3586_v20  ;;  %v2917_v58 = vld [vmem:[%s4296_s3 + $0x40] ss:$24 sps:$4 sm:$0xff]   ;;  %v2922_v59 = vld [vmem:[%s4296_s3 + $0x74] ss:$24 sps:$4 sm:$0xff]  }
  0x58   :  { %906 = vmatprep.subr.bf16.mxu0 %v2907_v12  ;;  %v2920_v60 = vld [vmem:[%s4296_s3 + $0x70] ss:$24 sps:$4 sm:$0xff]   ;;  %v2925_v61 = vld [vmem:[%s4296_s3 + $0xa4] ss:$24 sps:$4 sm:$0xff]   ;;  %v2923_v62 = vld [vmem:[%s4296_s3 + $0xa0] ss:$24 sps:$4 sm:$0xff]  }
  0x59   :  { %864 = vmatpush1.bf16.msra.mxu1 %v2904_v11  ;;  %v69_v24 = vrot.slane %v64_v22, %v3589_v21  ;;  %v73_v25 = vrot.slane %v64_v22, %v3595_v23  ;;  %v2928_v63 = vld [vmem:[%s4296_s3 + $0xd4] ss:$24 sps:$4 sm:$0xff]   ;;  %v2926_v0 = vld [vmem:[%s4296_s3 + $0xd0] ss:$24 sps:$4 sm:$0xff]   ;;  %v2931_v1 = vld [vmem:[%s4296_s3 + $0x104] ss:$24 sps:$4 sm:$0xff]  }
  0x5a   :  { %865 = vmatprep.subr.bf16.mxu1 %v2908_v14  ;;  %v2929_v2 = vld [vmem:[%s4296_s3 + $0x100] ss:$24 sps:$4 sm:$0xff]   ;;  %v2934_v3 = vld [vmem:[%s4296_s3 + $0x134] ss:$24 sps:$4 sm:$0xff]   ;;  %v2932_v4 = vld [vmem:[%s4296_s3 + $0x130] ss:$24 sps:$4 sm:$0xff]  }
  0x5b   :  { %907 = vmatpush1.bf16.msra.mxu0 %v2905_v13  ;;  %v2937_v5 = vld [vmem:[%s4296_s3 + $0x164] ss:$24 sps:$4 sm:$0xff]   ;;  %v2935_v6 = vld [vmem:[%s4296_s3 + $0x160] ss:$24 sps:$4 sm:$0xff]   ;;  %v2940_v7 = vld [vmem:[%s4296_s3 + $0x194] ss:$24 sps:$4 sm:$0xff]  }
  0x5c   :  { %908 = vmatprep.subr.bf16.mxu0 %v2913_v16  ;;  %v2938_v8 = vld [vmem:[%s4296_s3 + $0x190] ss:$24 sps:$4 sm:$0xff]   ;;  %v2943_v9 = vld [vmem:[%s4296_s3 + $0x1c4] ss:$24 sps:$4 sm:$0xff]   ;;  %v2941_v10 = vld [vmem:[%s4296_s3 + $0x1c0] ss:$24 sps:$4 sm:$0xff]  }
  0x5d   :  { %866 = vmatpush1.bf16.msra.mxu1 %v2910_v15  ;;  %v2946_v11 = vld [vmem:[%s4296_s3 + $0x1f4] ss:$24 sps:$4 sm:$0xff]   ;;  %v2944_v12 = vld [vmem:[%s4296_s3 + $0x1f0] ss:$24 sps:$4 sm:$0xff]   ;;  %v2949_v13 = vld [vmem:[%s4296_s3 + $0x224] ss:$24 sps:$4 sm:$0xff]  }
  0x5e   :  { %921 = vmatprep.subr.bf16.mxu1 %v2916_v18  ;;  %v2947_v14 = vld [vmem:[%s4296_s3 + $0x220] ss:$24 sps:$4 sm:$0xff]   ;;  %v2952_v15 = vld [vmem:[%s4296_s3 + $0x254] ss:$24 sps:$4 sm:$0xff]   ;;  %v2950_v16 = vld [vmem:[%s4296_s3 + $0x250] ss:$24 sps:$4 sm:$0xff]  }
  0x5f   :  { %909 = vmatpush1.bf16.msra.mxu0 %v2911_v17  ;;  %v2955_v17 = vld [vmem:[%s4296_s3 + $0x284] ss:$24 sps:$4 sm:$0xff]   ;;  %v2953_v18 = vld [vmem:[%s4296_s3 + $0x280] ss:$24 sps:$4 sm:$0xff]   ;;  %v2958_v19 = vld [vmem:[%s4296_s3 + $0x2b4] ss:$24 sps:$4 sm:$0xff]  }
  0x60   :  { %v2956_v22 = vld [vmem:[%s4296_s3 + $0x2b0] ss:$24 sps:$4 sm:$0xff]   ;;  %s2442_s18 = sshll.u32 %s3267_s17, 4  ;;  %s2443_s18 = int_to_ptr.vmem [resolvable:$true] %s2442_s18 }
  0x61   :  { %s3242_s19 = scalar_lea.vmem %s2443_s18, 256  ;;  %p3247_p1 = scmp.lt.s32.totalorder %s2443_s18, %s2443_s18 }
  0x62   :  { %p3243_p0 = scmp.ne.s32.totalorder %s2443_s18, %s3242_s19  ;;  %p3248_p2 = scmp.lt.s32.totalorder %s3242_s19, %s3242_s19 }
  0x64   :  { %p3249_p3 = por %p3248_p2, %p3247_p1 }
  0x66   :  { %p3250_p4 = pnand %p3249_p3, %p3243_p0 }
  0xf5   :  { %v196_v26 = vpop.f32.mrb[0].mxu0 }
  0xf6   :  { %v197_v27 = vadd.f32 %v196_v26, %v69_v24  ;;  %v198_v28 = vpop.f32.mrb[1].mxu0  ;;  %v2964_v26 = vld [vmem:[%s4298_s5 + $0x4] ss:$8 sps:$4 sm:$0xff]  }
  0xf7   :  { %v199_v29 = vadd.f32 %v198_v28, %v73_v25  ;;  %v200_v30 = vpop.f32.mrb[2].mxu0  ;;  %v2967_v28 = vld [vmem:[%s4298_s5 + $0x14] ss:$8 sps:$4 sm:$0xff]  }
  0xf8   :  { %v209_v31 = vmul.f32 0.70710677, %v197_v27  ;;  %v201_v32 = vadd.f32 %v200_v30, %v69_v24  ;;  %v202_v33 = vpop.f32.mrb[3].mxu0  ;;  %v205_v44 = vmul.f32 0.5, %v197_v27  ;;  %v2961_v24 = vld [vmem:[%s4296_s3 + $0x2e4] ss:$24 sps:$4 sm:$0xff]  }
  0xf9   :  { %v210_v34 = vmul.f32 0.70710677, %v199_v29  ;;  %v203_v35 = vadd.f32 %v202_v33, %v73_v25  ;;  %v206_v47 = vmul.f32 0.5, %v199_v29  ;;  %v2959_v25 = vld [vmem:[%s4296_s3 + $0x2e0] ss:$24 sps:$4 sm:$0xff]  }
  0xfa   :  { %3218 = verf.f32 %v209_v31  ;;  %v211_v36 = vmul.f32 0.70710677, %v201_v32  ;;  %v207_v45 = vmul.f32 0.5, %v201_v32  ;;  %v2962_v27 = vld [vmem:[%s4298_s5] ss:$8 sps:$4 sm:$0xff]  }
  0xfb   :  { %3220 = verf.f32 %v210_v34  ;;  %v212_v37 = vmul.f32 0.70710677, %v203_v35  ;;  %v208_v48 = vmul.f32 0.5, %v203_v35  ;;  %v2965_v29 = vld [vmem:[%s4298_s5 + $0x10] ss:$8 sps:$4 sm:$0xff]  }
  0xfc   :  { %3222 = verf.f32 %v211_v36  ;;  %v2970_v30 = vld [vmem:[%s4298_s5 + $0x24] ss:$8 sps:$4 sm:$0xff]   ;;  %v2968_v31 = vld [vmem:[%s4298_s5 + $0x20] ss:$8 sps:$4 sm:$0xff]   ;;  %v2973_v32 = vld [vmem:[%s4298_s5 + $0x34] ss:$8 sps:$4 sm:$0xff]  }
  0xfd   :  { %3224 = verf.f32 %v212_v37  ;;  %v2971_v33 = vld [vmem:[%s4298_s5 + $0x30] ss:$8 sps:$4 sm:$0xff]   ;;  %v2976_v34 = vld [vmem:[%s4298_s5 + $0x44] ss:$8 sps:$4 sm:$0xff]   ;;  %v2974_v35 = vld [vmem:[%s4298_s5 + $0x40] ss:$8 sps:$4 sm:$0xff]  }
  0xfe   :  { %v2979_v36 = vld [vmem:[%s4298_s5 + $0x54] ss:$8 sps:$4 sm:$0xff]   ;;  %v2977_v37 = vld [vmem:[%s4298_s5 + $0x50] ss:$8 sps:$4 sm:$0xff]  }
 0x104   :  { %v3219_v38 = vpop.eup %3218 }
 0x105   :  { %v3221_v39 = vpop.eup %3220  ;;  %v217_v40 = vadd.f32 1.0, %v3219_v38  ;;  %v2982_v38 = vld [vmem:[%s4298_s5 + $0x64] ss:$8 sps:$4 sm:$0xff]  }
 0x106   :  { %v3223_v41 = vpop.eup %3222  ;;  %v218_v42 = vadd.f32 1.0, %v3221_v39  ;;  %v2980_v39 = vld [vmem:[%s4298_s5 + $0x60] ss:$8 sps:$4 sm:$0xff]  }
 0x107   :  { %v3225_v43 = vpop.eup %3224  ;;  %v219_v46 = vadd.f32 1.0, %v3223_v41  ;;  %v221_v50 = vmul.f32 %v217_v40, %v205_v44  ;;  %v2985_v40 = vld [vmem:[%s4298_s5 + $0x74] ss:$8 sps:$4 sm:$0xff]   ;;  %v2983_v41 = vld [vmem:[%s4298_s5 + $0x70] ss:$8 sps:$4 sm:$0xff]  }
 0x108   :  { %v220_v49 = vadd.f32 1.0, %v3225_v43  ;;  %v222_v52 = vmul.f32 %v218_v42, %v206_v47  ;;  %v2988_v42 = vld [vmem:[%s4298_s5 + $0x84] ss:$8 sps:$4 sm:$0xff]   ;;  %v2986_v43 = vld [vmem:[%s4298_s5 + $0x80] ss:$8 sps:$4 sm:$0xff]  }
 0x109   :  { %v223_v51 = vmul.f32 %v219_v46, %v207_v45  ;;  %v2991_v44 = vld [vmem:[%s4298_s5 + $0x94] ss:$8 sps:$4 sm:$0xff]   ;;  %v2989_v45 = vld [vmem:[%s4298_s5 + $0x90] ss:$8 sps:$4 sm:$0xff]   ;;  %v2994_v46 = vld [vmem:[%s4298_s5 + $0xa4] ss:$8 sps:$4 sm:$0xff]  }
 0x10a   :  { %v224_v53 = vmul.f32 %v220_v49, %v208_v48  ;;  %v2992_v47 = vld [vmem:[%s4298_s5 + $0xa0] ss:$8 sps:$4 sm:$0xff]   ;;  %v2997_v48 = vld [vmem:[%s4298_s5 + $0xb4] ss:$8 sps:$4 sm:$0xff]   ;;  %v2995_v49 = vld [vmem:[%s4298_s5 + $0xb0] ss:$8 sps:$4 sm:$0xff]  }
 0x10b   :  { %v3599_v54 = vpack.c.bf16 %v223_v51, %v221_v50  ;;  %v3000_v50 = vld [vmem:[%s4298_s5 + $0xc4] ss:$8 sps:$4 sm:$0xff]   ;;  %v2998_v51 = vld [vmem:[%s4298_s5 + $0xc0] ss:$8 sps:$4 sm:$0xff]  }
 0x10c   :  { %v226_v55 = vpack.c.bf16 %v224_v53, %v222_v52  ;;  %v3003_v52 = vld [vmem:[%s4298_s5 + $0xd4] ss:$8 sps:$4 sm:$0xff]   ;;  %v3010_v53 = vld [vmem:[%s4300_s7] ss:$24 sps:$4 sm:$0xff]  }
 0x10e   :  { %867 = vmatprep.mubr.bf16.mxu1 %v226_v55  ;;  %910 = vmatprep.mubr.bf16.mxu0 %v226_v55 }
 0x10f   :  { %868 = vmatmul.mubr.bf16.vlgmr.msra.gmra.mrb[0].mxu1 %v3599_v54  ;;  %911 = vmatmul.mubr.bf16.vlgmr.msra.gmra.mrb[4].mxu0 %v3599_v54 }
 0x110   :  { %922 = vmatpush1.bf16.msra.mxu1 %v2914_v56  ;;  %953 = vmatprep.mubr.bf16.mxu1 %v226_v55  ;;  %v3018_v55 = vld [vmem:[%s4300_s7 + $0x34] ss:$24 sps:$4 sm:$0xff]   ;;  %v3001_v56 = vld [vmem:[%s4298_s5 + $0xd0] ss:$8 sps:$4 sm:$0xff]  }
 0x111   :  { %923 = vmatprep.subr.bf16.mxu1 %v2919_v57  ;;  %v3006_v57 = vld [vmem:[%s4298_s5 + $0xe4] ss:$8 sps:$4 sm:$0xff]  }
 0x114   :  { %924 = vmatpush1.bf16.msra.mxu1 %v2917_v58  ;;  %v3016_v58 = vld [vmem:[%s4300_s7 + $0x30] ss:$24 sps:$4 sm:$0xff]  }
 0x115   :  { %925 = vmatprep.subr.bf16.mxu1 %v2922_v59  ;;  %v3024_v59 = vld [vmem:[%s4300_s7 + $0x64] ss:$24 sps:$4 sm:$0xff]  }
 0x118   :  { %926 = vmatpush1.bf16.msra.mxu1 %v2920_v60  ;;  %v3004_v60 = vld [vmem:[%s4298_s5 + $0xe0] ss:$8 sps:$4 sm:$0xff]  }
 0x119   :  { %927 = vmatprep.subr.bf16.mxu1 %v2925_v61  ;;  %v3009_v61 = vld [vmem:[%s4298_s5 + $0xf4] ss:$8 sps:$4 sm:$0xff]  }
 0x11c   :  { %928 = vmatpush1.bf16.msra.mxu1 %v2923_v62  ;;  %v3022_v62 = vld [vmem:[%s4300_s7 + $0x60] ss:$24 sps:$4 sm:$0xff]  }
 0x11d   :  { %929 = vmatprep.subr.bf16.mxu1 %v2928_v63  ;;  %v3030_v63 = vld [vmem:[%s4300_s7 + $0x94] ss:$24 sps:$4 sm:$0xff]  }
 0x120   :  { %930 = vmatpush1.bf16.msra.mxu1 %v2926_v0  ;;  %v3007_v0 = vld [vmem:[%s4298_s5 + $0xf0] ss:$8 sps:$4 sm:$0xff]  }
 0x121   :  { %931 = vmatprep.subr.bf16.mxu1 %v2931_v1  ;;  %v3015_v1 = vld [vmem:[%s4300_s7 + $0x14] ss:$24 sps:$4 sm:$0xff]  }
 0x124   :  { %932 = vmatpush1.bf16.msra.mxu1 %v2929_v2  ;;  %v3028_v2 = vld [vmem:[%s4300_s7 + $0x90] ss:$24 sps:$4 sm:$0xff]  }
 0x125   :  { %933 = vmatprep.subr.bf16.mxu1 %v2934_v3  ;;  %v3036_v3 = vld [vmem:[%s4300_s7 + $0xc4] ss:$24 sps:$4 sm:$0xff]  }
 0x128   :  { %934 = vmatpush1.bf16.msra.mxu1 %v2932_v4  ;;  %v3034_v4 = vld [vmem:[%s4300_s7 + $0xc0] ss:$24 sps:$4 sm:$0xff]  }
 0x129   :  { %935 = vmatprep.subr.bf16.mxu1 %v2937_v5  ;;  %v3042_v5 = vld [vmem:[%s4300_s7 + $0xf4] ss:$24 sps:$4 sm:$0xff]  }
 0x12c   :  { %936 = vmatpush1.bf16.msra.mxu1 %v2935_v6  ;;  %v3040_v6 = vld [vmem:[%s4300_s7 + $0xf0] ss:$24 sps:$4 sm:$0xff]  }
 0x12d   :  { %937 = vmatprep.subr.bf16.mxu1 %v2940_v7  ;;  %v3048_v7 = vld [vmem:[%s4300_s7 + $0x124] ss:$24 sps:$4 sm:$0xff]  }
 0x130   :  { %938 = vmatpush1.bf16.msra.mxu1 %v2938_v8  ;;  %v3046_v8 = vld [vmem:[%s4300_s7 + $0x120] ss:$24 sps:$4 sm:$0xff]  }
 0x131   :  { %939 = vmatprep.subr.bf16.mxu1 %v2943_v9  ;;  %v3054_v9 = vld [vmem:[%s4300_s7 + $0x154] ss:$24 sps:$4 sm:$0xff]  }
 0x134   :  { %940 = vmatpush1.bf16.msra.mxu1 %v2941_v10  ;;  %v3052_v10 = vld [vmem:[%s4300_s7 + $0x150] ss:$24 sps:$4 sm:$0xff]  }
 0x135   :  { %941 = vmatprep.subr.bf16.mxu1 %v2946_v11  ;;  %v3060_v11 = vld [vmem:[%s4300_s7 + $0x184] ss:$24 sps:$4 sm:$0xff]  }
 0x138   :  { %942 = vmatpush1.bf16.msra.mxu1 %v2944_v12  ;;  %v3058_v12 = vld [vmem:[%s4300_s7 + $0x180] ss:$24 sps:$4 sm:$0xff]  }
 0x139   :  { %943 = vmatprep.subr.bf16.mxu1 %v2949_v13  ;;  %v3066_v13 = vld [vmem:[%s4300_s7 + $0x1b4] ss:$24 sps:$4 sm:$0xff]  }
 0x13c   :  { %944 = vmatpush1.bf16.msra.mxu1 %v2947_v14  ;;  %v3064_v14 = vld [vmem:[%s4300_s7 + $0x1b0] ss:$24 sps:$4 sm:$0xff]  }
 0x13d   :  { %945 = vmatprep.subr.bf16.mxu1 %v2952_v15  ;;  %v3072_v15 = vld [vmem:[%s4300_s7 + $0x1e4] ss:$24 sps:$4 sm:$0xff]  }
 0x140   :  { %946 = vmatpush1.bf16.msra.mxu1 %v2950_v16  ;;  %v3070_v16 = vld [vmem:[%s4300_s7 + $0x1e0] ss:$24 sps:$4 sm:$0xff]  }
 0x141   :  { %947 = vmatprep.subr.bf16.mxu1 %v2955_v17  ;;  %v3078_v17 = vld [vmem:[%s4300_s7 + $0x214] ss:$24 sps:$4 sm:$0xff]  }
 0x144   :  { %948 = vmatpush1.bf16.msra.mxu1 %v2953_v18  ;;  %v3076_v18 = vld [vmem:[%s4300_s7 + $0x210] ss:$24 sps:$4 sm:$0xff]  }
 0x145   :  { %949 = vmatprep.subr.bf16.mxu1 %v2958_v19  ;;  %v3084_v19 = vld [vmem:[%s4300_s7 + $0x244] ss:$24 sps:$4 sm:$0xff]  }
 0x148   :  { %950 = vmatpush1.bf16.msra.mxu1 %v2956_v22  ;;  %v3082_v22 = vld [vmem:[%s4300_s7 + $0x240] ss:$24 sps:$4 sm:$0xff]  }
 0x149   :  { %951 = vmatprep.subr.bf16.mxu1 %v2961_v24  ;;  %v3090_v24 = vld [vmem:[%s4300_s7 + $0x274] ss:$24 sps:$4 sm:$0xff]  }
 0x14c   :  { %952 = vmatpush1.bf16.msra.mxu1 %v2959_v25  ;;  %v3088_v25 = vld [vmem:[%s4300_s7 + $0x270] ss:$24 sps:$4 sm:$0xff]  }
 0x14d   :  { %1194 = vmatprep.subr.bf16.mxu1 %v2964_v26  ;;  %v3883_v26 = vld [vmem:[%s4297_s4] sm:$0x3f] }
 0x14f   :  { %954 = vmatmul.mubr.bf16.vlgmr.msra.gmra.mrb[4].mxu1 %v3599_v54  ;;  %v3012_v54 = vld [vmem:[%s4300_s7 + $0x4] ss:$24 sps:$4 sm:$0xff]  }
 0x150   :  { %1195 = vmatpush1.bf16.msra.mxu1 %v2962_v27  ;;  %1851 = vmatprep.subr.bf16.mxu0 %v3012_v54  ;;  %v328_v27 = vrot.slane %v3883_v26, %v3589_v21 }
 0x151   :  { %1196 = vmatprep.subr.bf16.mxu1 %v2967_v28  ;;  %1852 = vmatpush1.bf16.msra.mxu0 %v3010_v53  ;;  %v332_v28 = vrot.slane %v3883_v26, %v3595_v23 }
 0x152   :  { %1853 = vmatprep.subr.bf16.mxu0 %v3018_v55 }
 0x154   :  { %1197 = vmatpush1.bf16.msra.mxu1 %v2965_v29 }
 0x155   :  { %1198 = vmatprep.subr.bf16.mxu1 %v2970_v30  ;;  %1854 = vmatpush1.bf16.msra.mxu0 %v3016_v58 }
 0x156   :  { %1855 = vmatprep.subr.bf16.mxu0 %v3024_v59 }
 0x158   :  { %1199 = vmatpush1.bf16.msra.mxu1 %v2968_v31 }
 0x159   :  { %1200 = vmatprep.subr.bf16.mxu1 %v2973_v32  ;;  %1856 = vmatpush1.bf16.msra.mxu0 %v3022_v62 }
 0x15a   :  { %1857 = vmatprep.subr.bf16.mxu0 %v3030_v63 }
 0x15c   :  { %1201 = vmatpush1.bf16.msra.mxu1 %v2971_v33 }
 0x15d   :  { %1202 = vmatprep.subr.bf16.mxu1 %v2976_v34  ;;  %1858 = vmatpush1.bf16.msra.mxu0 %v3028_v2 }
 0x15e   :  { %1859 = vmatprep.subr.bf16.mxu0 %v3036_v3 }
 0x160   :  { %1203 = vmatpush1.bf16.msra.mxu1 %v2974_v35 }
 0x161   :  { %1204 = vmatprep.subr.bf16.mxu1 %v2979_v36  ;;  %1860 = vmatpush1.bf16.msra.mxu0 %v3034_v4 }
 0x162   :  { %1861 = vmatprep.subr.bf16.mxu0 %v3042_v5 }
 0x164   :  { %1205 = vmatpush1.bf16.msra.mxu1 %v2977_v37 }
 0x165   :  { %1206 = vmatprep.subr.bf16.mxu1 %v2982_v38  ;;  %1862 = vmatpush1.bf16.msra.mxu0 %v3040_v6 }
 0x166   :  { %1863 = vmatprep.subr.bf16.mxu0 %v3048_v7 }
 0x168   :  { %1207 = vmatpush1.bf16.msra.mxu1 %v2980_v39 }
 0x169   :  { %1208 = vmatprep.subr.bf16.mxu1 %v2985_v40  ;;  %1864 = vmatpush1.bf16.msra.mxu0 %v3046_v8 }
 0x16a   :  { %1865 = vmatprep.subr.bf16.mxu0 %v3054_v9 }
 0x16c   :  { %1209 = vmatpush1.bf16.msra.mxu1 %v2983_v41 }
 0x16d   :  { %1210 = vmatprep.subr.bf16.mxu1 %v2988_v42  ;;  %1866 = vmatpush1.bf16.msra.mxu0 %v3052_v10 }
 0x16e   :  { %1867 = vmatprep.subr.bf16.mxu0 %v3060_v11  ;;  %v3013_v11 = vld [vmem:[%s4300_s7 + $0x10] ss:$24 sps:$4 sm:$0xff]  }
 0x170   :  { %1211 = vmatpush1.bf16.msra.mxu1 %v2986_v43 }
 0x171   :  { %1212 = vmatprep.subr.bf16.mxu1 %v2991_v44  ;;  %1868 = vmatpush1.bf16.msra.mxu0 %v3058_v12  ;;  %v3021_v12 = vld [vmem:[%s4300_s7 + $0x44] ss:$24 sps:$4 sm:$0xff]  }
 0x172   :  { %1869 = vmatprep.subr.bf16.mxu0 %v3066_v13  ;;  %v3019_v13 = vld [vmem:[%s4300_s7 + $0x40] ss:$24 sps:$4 sm:$0xff]  }
 0x174   :  { %1213 = vmatpush1.bf16.msra.mxu1 %v2989_v45  ;;  %v335_v45 = vsub.s32 2, %v3586_v20 }
 0x175   :  { %1214 = vmatprep.subr.bf16.mxu1 %v2994_v46  ;;  %1870 = vmatpush1.bf16.msra.mxu0 %v3064_v14  ;;  %v339_v46 = vsub.s32 3, %v3586_v20  ;;  %v3027_v14 = vld [vmem:[%s4300_s7 + $0x74] ss:$24 sps:$4 sm:$0xff]  }
 0x176   :  { %1871 = vmatprep.subr.bf16.mxu0 %v3072_v15  ;;  %v3025_v15 = vld [vmem:[%s4300_s7 + $0x70] ss:$24 sps:$4 sm:$0xff]  }
 0x178   :  { %1215 = vmatpush1.bf16.msra.mxu1 %v2992_v47  ;;  %v336_v47 = vrot.slane %v3883_v26, %v335_v45 }
 0x179   :  { %1216 = vmatprep.subr.bf16.mxu1 %v2997_v48  ;;  %1872 = vmatpush1.bf16.msra.mxu0 %v3070_v16  ;;  %v3033_v16 = vld [vmem:[%s4300_s7 + $0xa4] ss:$24 sps:$4 sm:$0xff]  }
 0x17a   :  { %1873 = vmatprep.subr.bf16.mxu0 %v3078_v17  ;;  %v3031_v17 = vld [vmem:[%s4300_s7 + $0xa0] ss:$24 sps:$4 sm:$0xff]  }
 0x17c   :  { %1217 = vmatpush1.bf16.msra.mxu1 %v2995_v49  ;;  %v340_v49 = vrot.slane %v3883_v26, %v339_v46 }
 0x17d   :  { %1218 = vmatprep.subr.bf16.mxu1 %v3000_v50  ;;  %1874 = vmatpush1.bf16.msra.mxu0 %v3076_v18  ;;  %v3039_v18 = vld [vmem:[%s4300_s7 + $0xd4] ss:$24 sps:$4 sm:$0xff]  }
 0x17e   :  { %1875 = vmatprep.subr.bf16.mxu0 %v3084_v19  ;;  %v3037_v19 = vld [vmem:[%s4300_s7 + $0xd0] ss:$24 sps:$4 sm:$0xff]  }
 0x180   :  { %1219 = vmatpush1.bf16.msra.mxu1 %v2998_v51 }
 0x181   :  { %1220 = vmatprep.subr.bf16.mxu1 %v3003_v52  ;;  %1876 = vmatpush1.bf16.msra.mxu0 %v3082_v22  ;;  %v3045_v22 = vld [vmem:[%s4300_s7 + $0x104] ss:$24 sps:$4 sm:$0xff]  }
 0x182   :  { %1877 = vmatprep.subr.bf16.mxu0 %v3090_v24  ;;  %v3043_v24 = vld [vmem:[%s4300_s7 + $0x100] ss:$24 sps:$4 sm:$0xff]  }
 0x184   :  { %1221 = vmatpush1.bf16.msra.mxu1 %v3001_v56 }
 0x185   :  { %1222 = vmatprep.subr.bf16.mxu1 %v3006_v57  ;;  %1878 = vmatpush1.bf16.msra.mxu0 %v3088_v25  ;;  %v3051_v25 = vld [vmem:[%s4300_s7 + $0x134] ss:$24 sps:$4 sm:$0xff]  }
 0x188   :  { %1223 = vmatpush1.bf16.msra.mxu1 %v3004_v60 }
 0x189   :  { %1224 = vmatprep.subr.bf16.mxu1 %v3009_v61 }
 0x18c   :  { %1225 = vmatpush1.bf16.msra.mxu1 %v3007_v0 }
 0x18d   :  { %1937 = vmatprep.subr.bf16.mxu1 %v3015_v1 }
 0x1e2   :  { %v869_v29 = vpop.f32.mrb[0].mxu1  ;;  %v912_v30 = vpop.f32.mrb[4].mxu0 }
 0x1e3   :  { %v870_v31 = vadd.f32 %v869_v29, %v328_v27  ;;  %v871_v32 = vpop.f32.mrb[1].mxu1  ;;  %v914_v33 = vpop.f32.mrb[5].mxu0  ;;  %v913_v57 = vadd.f32 %v912_v30, %v336_v47  ;;  %v3055_v29 = vld [vmem:[%s4300_s7 + $0x160] ss:$24 sps:$4 sm:$0xff]   ;;  %v3063_v30 = vld [vmem:[%s4300_s7 + $0x194] ss:$24 sps:$4 sm:$0xff]  }
 0x1e4   :  { %v872_v34 = vadd.f32 %v871_v32, %v332_v28  ;;  %v873_v35 = vpop.f32.mrb[2].mxu1  ;;  %v916_v36 = vpop.f32.mrb[6].mxu0  ;;  %v915_v61 = vadd.f32 %v914_v33, %v340_v49  ;;  %v3069_v32 = vld [vmem:[%s4300_s7 + $0x1c4] ss:$24 sps:$4 sm:$0xff]   ;;  %v3067_v33 = vld [vmem:[%s4300_s7 + $0x1c0] ss:$24 sps:$4 sm:$0xff]  }
 0x1e5   :  { %v968_v37 = vmul.f32 0.70710677, %v870_v31  ;;  %v874_v38 = vadd.f32 %v873_v35, %v328_v27  ;;  %v875_v39 = vpop.f32.mrb[3].mxu1  ;;  %v918_v40 = vpop.f32.mrb[7].mxu0  ;;  %v964_v51 = vmul.f32 0.5, %v870_v31  ;;  %v917_v2 = vadd.f32 %v916_v36, %v336_v47 }
 0x1e6   :  { %v969_v41 = vmul.f32 0.70710677, %v872_v34  ;;  %v876_v42 = vadd.f32 %v875_v39, %v332_v28  ;;  %v965_v54 = vmul.f32 0.5, %v872_v34  ;;  %v919_v5 = vadd.f32 %v918_v40, %v340_v49  ;;  %v3049_v27 = vld [vmem:[%s4300_s7 + $0x130] ss:$24 sps:$4 sm:$0xff]  }
 0x1e7   :  { %3226 = verf.f32 %v968_v37  ;;  %v970_v43 = vmul.f32 0.70710677, %v874_v38  ;;  %v966_v59 = vmul.f32 0.5, %v874_v38  ;;  %v3057_v28 = vld [vmem:[%s4300_s7 + $0x164] ss:$24 sps:$4 sm:$0xff]  }
 0x1e8   :  { %3228 = verf.f32 %v969_v41  ;;  %v971_v44 = vmul.f32 0.70710677, %v876_v42  ;;  %v967_v63 = vmul.f32 0.5, %v876_v42  ;;  %v3061_v31 = vld [vmem:[%s4300_s7 + $0x190] ss:$24 sps:$4 sm:$0xff]  }
 0x1e9   :  { %3230 = verf.f32 %v970_v43  ;;  %v3075_v34 = vld [vmem:[%s4300_s7 + $0x1f4] ss:$24 sps:$4 sm:$0xff]   ;;  %v3073_v35 = vld [vmem:[%s4300_s7 + $0x1f0] ss:$24 sps:$4 sm:$0xff]   ;;  %v3081_v36 = vld [vmem:[%s4300_s7 + $0x224] ss:$24 sps:$4 sm:$0xff]  }
 0x1ea   :  { %3232 = verf.f32 %v971_v44  ;;  %v3079_v37 = vld [vmem:[%s4300_s7 + $0x220] ss:$24 sps:$4 sm:$0xff]   ;;  %v3087_v38 = vld [vmem:[%s4300_s7 + $0x254] ss:$24 sps:$4 sm:$0xff]   ;;  %v3085_v39 = vld [vmem:[%s4300_s7 + $0x250] ss:$24 sps:$4 sm:$0xff]  }
 0x1eb   :  { %v3093_v40 = vld [vmem:[%s4300_s7 + $0x284] ss:$24 sps:$4 sm:$0xff]   ;;  %v3091_v41 = vld [vmem:[%s4300_s7 + $0x280] ss:$24 sps:$4 sm:$0xff]   ;;  %v3099_v44 = vld [vmem:[%s4300_s7 + $0x2b4] ss:$24 sps:$4 sm:$0xff]  }
 0x1ec   :  { %v3096_v42 = vld [vmem:[%s4300_s7 + $0x2a4] ss:$24 sps:$4 sm:$0xff]   ;;  %v3094_v43 = vld [vmem:[%s4300_s7 + $0x2a0] ss:$24 sps:$4 sm:$0xff]   ;;  %v3097_v47 = vld [vmem:[%s4300_s7 + $0x2b0] ss:$24 sps:$4 sm:$0xff]  }
 0x1ed   :  { %1879 = vmatprep.subr.bf16.mxu0 %v3096_v42  ;;  %v3100_v49 = vld [vmem:[%s4300_s7 + $0x2d0] ss:$24 sps:$4 sm:$0xff]   ;;  %v3156_v42 = vld [vmem:[%s4302_s9 + $0x4] ss:$8 sps:$4 sm:$0xff]  }
 0x1ee   :  { %1880 = vmatpush1.bf16.msra.mxu0 %v3094_v43  ;;  %v3154_v43 = vld [vmem:[%s4302_s9] ss:$8 sps:$4 sm:$0xff]  }
 0x1f1   :  { %v3227_v48 = vpop.eup %3226 }
 0x1f2   :  { %v3229_v50 = vpop.eup %3228  ;;  %v976_v52 = vadd.f32 1.0, %v3227_v48  ;;  %v3102_v48 = vld [vmem:[%s4300_s7 + $0x2d4] ss:$24 sps:$4 sm:$0xff]  }
 0x1f3   :  { %v3231_v53 = vpop.eup %3230  ;;  %v977_v55 = vadd.f32 1.0, %v3229_v50  ;;  %v3105_v50 = vld [vmem:[%s4300_s7 + $0x2e4] ss:$24 sps:$4 sm:$0xff]   ;;  %1881 = vmatprep.subr.bf16.mxu0 %v3102_v48 }
 0x1f4   :  { %v3233_v56 = vpop.eup %3232  ;;  %v980_v58 = vmul.f32 %v976_v52, %v964_v51  ;;  %v978_v60 = vadd.f32 1.0, %v3231_v53  ;;  %v3103_v51 = vld [vmem:[%s4300_s7 + $0x2e0] ss:$24 sps:$4 sm:$0xff]   ;;  %1882 = vmatpush1.bf16.msra.mxu0 %v3100_v49  ;;  %v3108_v52 = vld [vmem:[%s4300_s7 + $0xc] ss:$24 sps:$4 sm:$0xff]   ;;  %v343_v53 = vsub.s32 4, %v3586_v20 }
 0x1f5   :  { %v981_v62 = vmul.f32 %v977_v55, %v965_v54  ;;  %v979_v0 = vadd.f32 1.0, %v3233_v56  ;;  %1894 = vmatprep.subr.bf16.mxu0 %v3108_v52  ;;  %v1022_v54 = vld [vmem:[%s4299_s6] sm:$0x3]  ;;  %v347_v55 = vsub.s32 5, %v3586_v20  ;;  %v3162_v48 = vld [vmem:[%s4302_s9 + $0x24] ss:$8 sps:$4 sm:$0xff]  }
 0x1f6   :  { %v984_v1 = vmul.f32 %v980_v58, %v913_v57  ;;  %v982_v3 = vmul.f32 %v978_v60, %v966_v59  ;;  %v344_v56 = vrot.slane %v3883_v26, %v343_v53  ;;  %v1027_v57 = vrot.slane %v1022_v54, %v3589_v21  ;;  %v3160_v49 = vld [vmem:[%s4302_s9 + $0x20] ss:$8 sps:$4 sm:$0xff]   ;;  %v3168_v52 = vld [vmem:[%s4302_s9 + $0x44] ss:$8 sps:$4 sm:$0xff]  }
 0x1f7   :  { %v985_v4 = vmul.f32 %v981_v62, %v915_v61  ;;  %v983_v6 = vmul.f32 %v979_v0, %v967_v63  ;;  %v348_v58 = vrot.slane %v3883_v26, %v347_v55  ;;  %v1031_v59 = vrot.slane %v1022_v54, %v3595_v23  ;;  %v3111_v26 = vld [vmem:[%s4300_s7 + $0x3c] ss:$24 sps:$4 sm:$0xff]   ;;  %v3166_v54 = vld [vmem:[%s4302_s9 + $0x40] ss:$8 sps:$4 sm:$0xff]  }
 0x1f8   :  { %v986_v7 = vmul.f32 %v982_v3, %v917_v2  ;;  %v2765_v60 = vadd.f32 %v1027_v57, %v344_v56  ;;  %v3171_v56 = vld [vmem:[%s4302_s9 + $0x54] ss:$8 sps:$4 sm:$0xff]   ;;  %v3169_v57 = vld [vmem:[%s4302_s9 + $0x50] ss:$8 sps:$4 sm:$0xff]   ;;  %v2726_v20 = vld [vmem:[%s4305_s12] ss:$0 sm:$0xff] }
 0x1f9   :  { %v987_v8 = vmul.f32 %v983_v6, %v919_v5  ;;  %v2767_v62 = vadd.f32 %v1031_v59, %v348_v58  ;;  %v3174_v58 = vld [vmem:[%s4302_s9 + $0x64] ss:$8 sps:$4 sm:$0xff]   ;;  %v3172_v59 = vld [vmem:[%s4302_s9 + $0x60] ss:$8 sps:$4 sm:$0xff]  }
 0x1fa   :  { %v988_v9 = vpack.c.bf16 %v986_v7, %v984_v1 }
 0x1fb   :  { %v989_v10 = vpack.c.bf16 %v987_v8, %v985_v4  ;;  %v3106_v8 = vld [vmem:[%s4300_s7 + $0x8] ss:$24 sps:$4 sm:$0xff]  }
 0x1fd   :  { %1226 = vmatprep.mubr.bf16.mxu1 %v989_v10  ;;  %v3114_v10 = vld [vmem:[%s4300_s7 + $0x6c] ss:$24 sps:$4 sm:$0xff]  }
 0x1fe   :  { %1227 = vmatmul.mubr.bf16.vlgmr.msra.gmra.mrb[4].mxu1 %v988_v9  ;;  %v3109_v9 = vld [vmem:[%s4300_s7 + $0x38] ss:$24 sps:$4 sm:$0xff]  }
 0x1ff   :  { %1938 = vmatpush1.bf16.msra.mxu1 %v3013_v11  ;;  %v3112_v11 = vld [vmem:[%s4300_s7 + $0x68] ss:$24 sps:$4 sm:$0xff]  }
 0x200   :  { %1939 = vmatprep.subr.bf16.mxu1 %v3021_v12  ;;  %v3117_v12 = vld [vmem:[%s4300_s7 + $0x9c] ss:$24 sps:$4 sm:$0xff]  }
 0x203   :  { %1940 = vmatpush1.bf16.msra.mxu1 %v3019_v13  ;;  %v3115_v13 = vld [vmem:[%s4300_s7 + $0x98] ss:$24 sps:$4 sm:$0xff]  }
 0x204   :  { %1941 = vmatprep.subr.bf16.mxu1 %v3027_v14  ;;  %v3120_v14 = vld [vmem:[%s4300_s7 + $0xcc] ss:$24 sps:$4 sm:$0xff]  }
 0x207   :  { %1942 = vmatpush1.bf16.msra.mxu1 %v3025_v15  ;;  %v3118_v15 = vld [vmem:[%s4300_s7 + $0xc8] ss:$24 sps:$4 sm:$0xff]  }
 0x208   :  { %1943 = vmatprep.subr.bf16.mxu1 %v3033_v16  ;;  %v3123_v16 = vld [vmem:[%s4300_s7 + $0xfc] ss:$24 sps:$4 sm:$0xff]  }
 0x20b   :  { %1944 = vmatpush1.bf16.msra.mxu1 %v3031_v17  ;;  %v3121_v17 = vld [vmem:[%s4300_s7 + $0xf8] ss:$24 sps:$4 sm:$0xff]  }
 0x20c   :  { %1945 = vmatprep.subr.bf16.mxu1 %v3039_v18  ;;  %v3126_v18 = vld [vmem:[%s4300_s7 + $0x12c] ss:$24 sps:$4 sm:$0xff]  }
 0x20f   :  { %1946 = vmatpush1.bf16.msra.mxu1 %v3037_v19  ;;  %v3124_v19 = vld [vmem:[%s4300_s7 + $0x128] ss:$24 sps:$4 sm:$0xff]  }
 0x210   :  { %1947 = vmatprep.subr.bf16.mxu1 %v3045_v22  ;;  %v3129_v22 = vld [vmem:[%s4300_s7 + $0x15c] ss:$24 sps:$4 sm:$0xff]  }
 0x213   :  { %1948 = vmatpush1.bf16.msra.mxu1 %v3043_v24  ;;  %v3127_v24 = vld [vmem:[%s4300_s7 + $0x158] ss:$24 sps:$4 sm:$0xff]  }
 0x214   :  { %1949 = vmatprep.subr.bf16.mxu1 %v3051_v25  ;;  %v3132_v25 = vld [vmem:[%s4300_s7 + $0x18c] ss:$24 sps:$4 sm:$0xff]  }
 0x217   :  { %1950 = vmatpush1.bf16.msra.mxu1 %v3049_v27  ;;  %v3130_v27 = vld [vmem:[%s4300_s7 + $0x188] ss:$24 sps:$4 sm:$0xff]  }
 0x218   :  { %1951 = vmatprep.subr.bf16.mxu1 %v3057_v28  ;;  %v3135_v28 = vld [vmem:[%s4300_s7 + $0x1bc] ss:$24 sps:$4 sm:$0xff]  }
 0x21b   :  { %1952 = vmatpush1.bf16.msra.mxu1 %v3055_v29  ;;  %v3133_v29 = vld [vmem:[%s4300_s7 + $0x1b8] ss:$24 sps:$4 sm:$0xff]  }
 0x21c   :  { %1953 = vmatprep.subr.bf16.mxu1 %v3063_v30  ;;  %v3138_v30 = vld [vmem:[%s4300_s7 + $0x1ec] ss:$24 sps:$4 sm:$0xff]  }
 0x21f   :  { %1954 = vmatpush1.bf16.msra.mxu1 %v3061_v31  ;;  %v3136_v31 = vld [vmem:[%s4300_s7 + $0x1e8] ss:$24 sps:$4 sm:$0xff]  }
 0x220   :  { %1955 = vmatprep.subr.bf16.mxu1 %v3069_v32  ;;  %v3141_v32 = vld [vmem:[%s4300_s7 + $0x21c] ss:$24 sps:$4 sm:$0xff]  }
 0x223   :  { %1956 = vmatpush1.bf16.msra.mxu1 %v3067_v33  ;;  %v3139_v33 = vld [vmem:[%s4300_s7 + $0x218] ss:$24 sps:$4 sm:$0xff]  }
 0x224   :  { %1957 = vmatprep.subr.bf16.mxu1 %v3075_v34  ;;  %v3144_v34 = vld [vmem:[%s4300_s7 + $0x24c] ss:$24 sps:$4 sm:$0xff]  }
 0x227   :  { %1958 = vmatpush1.bf16.msra.mxu1 %v3073_v35  ;;  %v3142_v35 = vld [vmem:[%s4300_s7 + $0x248] ss:$24 sps:$4 sm:$0xff]  }
 0x228   :  { %1959 = vmatprep.subr.bf16.mxu1 %v3081_v36  ;;  %v3147_v36 = vld [vmem:[%s4300_s7 + $0x27c] ss:$24 sps:$4 sm:$0xff]  }
 0x22b   :  { %1960 = vmatpush1.bf16.msra.mxu1 %v3079_v37  ;;  %v3145_v37 = vld [vmem:[%s4300_s7 + $0x278] ss:$24 sps:$4 sm:$0xff]  }
 0x22c   :  { %1961 = vmatprep.subr.bf16.mxu1 %v3087_v38  ;;  %v3150_v38 = vld [vmem:[%s4300_s7 + $0x2ac] ss:$24 sps:$4 sm:$0xff]  }
 0x22f   :  { %1962 = vmatpush1.bf16.msra.mxu1 %v3085_v39  ;;  %v3148_v39 = vld [vmem:[%s4300_s7 + $0x2a8] ss:$24 sps:$4 sm:$0xff]  }
 0x230   :  { %1963 = vmatprep.subr.bf16.mxu1 %v3093_v40  ;;  %v3153_v40 = vld [vmem:[%s4300_s7 + $0x2dc] ss:$24 sps:$4 sm:$0xff]  }
 0x233   :  { %1964 = vmatpush1.bf16.msra.mxu1 %v3091_v41  ;;  %v3151_v41 = vld [vmem:[%s4300_s7 + $0x2d8] ss:$24 sps:$4 sm:$0xff]  }
 0x234   :  { %1965 = vmatprep.subr.bf16.mxu1 %v3099_v44  ;;  %v3159_v44 = vld [vmem:[%s4302_s9 + $0x14] ss:$8 sps:$4 sm:$0xff]  }
 0x237   :  { %1966 = vmatpush1.bf16.msra.mxu1 %v3097_v47  ;;  %v3157_v47 = vld [vmem:[%s4302_s9 + $0x10] ss:$8 sps:$4 sm:$0xff]  }
 0x238   :  { %1967 = vmatprep.subr.bf16.mxu1 %v3105_v50  ;;  %v3165_v50 = vld [vmem:[%s4302_s9 + $0x34] ss:$8 sps:$4 sm:$0xff]  }
 0x23b   :  { %1968 = vmatpush1.bf16.msra.mxu1 %v3103_v51  ;;  %v3163_v51 = vld [vmem:[%s4302_s9 + $0x30] ss:$8 sps:$4 sm:$0xff]  }
 0x23c   :  { %2210 = vmatprep.subr.bf16.mxu1 %v3156_v42 }
 0x2d1   :  { %v1228_v61 = vpop.f32.mrb[4].mxu1 }
 0x2d2   :  { %v1230_v63 = vpop.f32.mrb[5].mxu1  ;;  %v2766_v1 = vadd.f32 %v2765_v60, %v1228_v61  ;;  %v3175_v61 = vld [vmem:[%s4302_s9 + $0x70] ss:$8 sps:$4 sm:$0xff]  }
 0x2d3   :  { %v1232_v0 = vpop.f32.mrb[6].mxu1  ;;  %v2768_v4 = vadd.f32 %v2767_v62, %v1230_v63  ;;  %v3178_v63 = vld [vmem:[%s4302_s9 + $0x80] ss:$8 sps:$4 sm:$0xff]  }
 0x2d4   :  { %v2770_v2 = vadd.f32 %v2765_v60, %v1232_v0  ;;  %v1234_v3 = vpop.f32.mrb[7].mxu1  ;;  %v3177_v60 = vld [vmem:[%s4302_s9 + $0x74] ss:$8 sps:$4 sm:$0xff]  }
 0x2d5   :  { %v2772_v5 = vadd.f32 %v2767_v62, %v1234_v3  ;;  %v3180_v62 = vld [vmem:[%s4302_s9 + $0x84] ss:$8 sps:$4 sm:$0xff]   ;;  %v3183_v0 = vld [vmem:[%s4302_s9 + $0x94] ss:$8 sps:$4 sm:$0xff]   ;;  %v3184_v3 = vld [vmem:[%s4302_s9 + $0xa0] ss:$8 sps:$4 sm:$0xff]  }
 0x2d6   :  { %v4018_v6 = vpack.c.bf16 %v2770_v2, %v2766_v1  ;;  %v3181_v1 = vld [vmem:[%s4302_s9 + $0x90] ss:$8 sps:$4 sm:$0xff]   ;;  %v3186_v2 = vld [vmem:[%s4302_s9 + $0xa4] ss:$8 sps:$4 sm:$0xff]  }
 0x2d7   :  { %v1242_v7 = vpack.c.bf16 %v2772_v5, %v2768_v4  ;;  %v3189_v4 = vld [vmem:[%s4302_s9 + $0xb4] ss:$8 sps:$4 sm:$0xff]   ;;  %v3187_v5 = vld [vmem:[%s4302_s9 + $0xb0] ss:$8 sps:$4 sm:$0xff]  }
 0x2d9   :  { %1883 = vmatprep.mubr.bf16.mxu0 %v1242_v7  ;;  %1969 = vmatprep.mubr.bf16.mxu1 %v1242_v7 }
 0x2da   :  { %1884 = vmatmul.mubr.bf16.vlgmr.msra.gmra.mrb[8].mxu0 %v4018_v6  ;;  %1970 = vmatmul.mubr.bf16.vlgmr.msra.gmra.mrb[8].mxu1 %v4018_v6 }
 0x2db   :  { %1895 = vmatpush1.bf16.msra.mxu0 %v3106_v8  ;;  %1926 = vmatprep.mubr.bf16.mxu0 %v1242_v7  ;;  %v3190_v7 = vld [vmem:[%s4302_s9 + $0xc0] ss:$8 sps:$4 sm:$0xff]   ;;  %v3195_v8 = vld [vmem:[%s4302_s9 + $0xd4] ss:$8 sps:$4 sm:$0xff]  }
 0x2dc   :  { %1896 = vmatprep.subr.bf16.mxu0 %v3111_v26  ;;  %2211 = vmatpush1.bf16.msra.mxu1 %v3154_v43  ;;  %v3193_v26 = vld [vmem:[%s4302_s9 + $0xd0] ss:$8 sps:$4 sm:$0xff]  }
 0x2dd   :  { %2212 = vmatprep.subr.bf16.mxu1 %v3159_v44 }
 0x2df   :  { %1897 = vmatpush1.bf16.msra.mxu0 %v3109_v9  ;;  %v3198_v9 = vld [vmem:[%s4302_s9 + $0xe4] ss:$8 sps:$4 sm:$0xff]  }
 0x2e0   :  { %1898 = vmatprep.subr.bf16.mxu0 %v3114_v10  ;;  %2213 = vmatpush1.bf16.msra.mxu1 %v3157_v47  ;;  %v3196_v10 = vld [vmem:[%s4302_s9 + $0xe0] ss:$8 sps:$4 sm:$0xff]  }
 0x2e1   :  { %2214 = vmatprep.subr.bf16.mxu1 %v3162_v48 }
 0x2e3   :  { %1899 = vmatpush1.bf16.msra.mxu0 %v3112_v11  ;;  %v3201_v11 = vld [vmem:[%s4302_s9 + $0xf4] ss:$8 sps:$4 sm:$0xff]  }
 0x2e4   :  { %1900 = vmatprep.subr.bf16.mxu0 %v3117_v12  ;;  %2215 = vmatpush1.bf16.msra.mxu1 %v3160_v49  ;;  %v3199_v12 = vld [vmem:[%s4302_s9 + $0xf0] ss:$8 sps:$4 sm:$0xff]  }
 0x2e5   :  { %2216 = vmatprep.subr.bf16.mxu1 %v3165_v50 }
 0x2e7   :  { %1901 = vmatpush1.bf16.msra.mxu0 %v3115_v13  ;;  %v3202_v13 = vld [vmem:[%s4304_s11 + $0x40] sm:$0xff]  }
 0x2e8   :  { %1902 = vmatprep.subr.bf16.mxu0 %v3120_v14  ;;  %2217 = vmatpush1.bf16.msra.mxu1 %v3163_v51  ;;  %v3203_v14 = vld [vmem:[%s4304_s11] sm:$0xff]  }
 0x2e9   :  { %2218 = vmatprep.subr.bf16.mxu1 %v3168_v52 }
 0x2eb   :  { %1903 = vmatpush1.bf16.msra.mxu0 %v3118_v15  ;;  %v3204_v15 = vld [vmem:[%s4304_s11 + $0x48] sm:$0xff]  }
 0x2ec   :  { %1904 = vmatprep.subr.bf16.mxu0 %v3123_v16  ;;  %2219 = vmatpush1.bf16.msra.mxu1 %v3166_v54  ;;  %v3205_v16 = vld [vmem:[%s4304_s11 + $0x8] sm:$0xff]  }
 0x2ed   :  { %2220 = vmatprep.subr.bf16.mxu1 %v3171_v56 }
 0x2ef   :  { %1905 = vmatpush1.bf16.msra.mxu0 %v3121_v17  ;;  %v3206_v17 = vld [vmem:[%s4304_s11 + $0x50] sm:$0xff]  }
 0x2f0   :  { %1906 = vmatprep.subr.bf16.mxu0 %v3126_v18  ;;  %2221 = vmatpush1.bf16.msra.mxu1 %v3169_v57  ;;  %v3207_v18 = vld [vmem:[%s4304_s11 + $0x10] sm:$0xff]  }
 0x2f1   :  { %2222 = vmatprep.subr.bf16.mxu1 %v3174_v58 }
 0x2f3   :  { %1907 = vmatpush1.bf16.msra.mxu0 %v3124_v19  ;;  %v3208_v19 = vld [vmem:[%s4304_s11 + $0x58] sm:$0xff]  }
 0x2f4   :  { %1908 = vmatprep.subr.bf16.mxu0 %v3129_v22  ;;  %2223 = vmatpush1.bf16.msra.mxu1 %v3172_v59  ;;  %v3209_v22 = vld [vmem:[%s4304_s11 + $0x18] sm:$0xff]  }
 0x2f5   :  { %2224 = vmatprep.subr.bf16.mxu1 %v3177_v60 }
 0x2f7   :  { %1909 = vmatpush1.bf16.msra.mxu0 %v3127_v24  ;;  %v3210_v24 = vld [vmem:[%s4304_s11 + $0x60] sm:$0xff]  }
 0x2f8   :  { %1910 = vmatprep.subr.bf16.mxu0 %v3132_v25  ;;  %2225 = vmatpush1.bf16.msra.mxu1 %v3175_v61  ;;  %v3211_v25 = vld [vmem:[%s4304_s11 + $0x20] sm:$0xff]  }
 0x2f9   :  { %2226 = vmatprep.subr.bf16.mxu1 %v3180_v62 }
 0x2fb   :  { %1911 = vmatpush1.bf16.msra.mxu0 %v3130_v27  ;;  %v3212_v27 = vld [vmem:[%s4304_s11 + $0x68] sm:$0xff]  }
 0x2fc   :  { %1912 = vmatprep.subr.bf16.mxu0 %v3135_v28  ;;  %2227 = vmatpush1.bf16.msra.mxu1 %v3178_v63  ;;  %v3213_v28 = vld [vmem:[%s4304_s11 + $0x28] sm:$0xff]  }
 0x2fd   :  { %2228 = vmatprep.subr.bf16.mxu1 %v3183_v0 }
 0x2ff   :  { %1913 = vmatpush1.bf16.msra.mxu0 %v3133_v29 }
 0x300   :  { %1914 = vmatprep.subr.bf16.mxu0 %v3138_v30  ;;  %2229 = vmatpush1.bf16.msra.mxu1 %v3181_v1 }
 0x301   :  { %2230 = vmatprep.subr.bf16.mxu1 %v3186_v2 }
 0x303   :  { %1915 = vmatpush1.bf16.msra.mxu0 %v3136_v31 }
 0x304   :  { %1916 = vmatprep.subr.bf16.mxu0 %v3141_v32  ;;  %2231 = vmatpush1.bf16.msra.mxu1 %v3184_v3 }
 0x305   :  { %2232 = vmatprep.subr.bf16.mxu1 %v3189_v4 }
 0x307   :  { %1917 = vmatpush1.bf16.msra.mxu0 %v3139_v33  ;;  %v1339_v33 = vld [vmem:[%s4301_s8] sm:$0x3f] }
 0x308   :  { %1918 = vmatprep.subr.bf16.mxu0 %v3144_v34  ;;  %2233 = vmatpush1.bf16.msra.mxu1 %v3187_v5  ;;  %v1344_v34 = vrot.slane %v1339_v33, %v3589_v21  ;;  %v1352_v51 = vrot.slane %v1339_v33, %v335_v45  ;;  %v1356_v54 = vrot.slane %v1339_v33, %v339_v46 }
 0x30b   :  { %1919 = vmatpush1.bf16.msra.mxu0 %v3142_v35  ;;  %v1348_v35 = vrot.slane %v1339_v33, %v3595_v23 }
 0x30c   :  { %1920 = vmatprep.subr.bf16.mxu0 %v3147_v36 }
 0x30f   :  { %1921 = vmatpush1.bf16.msra.mxu0 %v3145_v37 }
 0x310   :  { %1922 = vmatprep.subr.bf16.mxu0 %v3150_v38 }
 0x313   :  { %1923 = vmatpush1.bf16.msra.mxu0 %v3148_v39 }
 0x314   :  { %1924 = vmatprep.subr.bf16.mxu0 %v3153_v40 }
 0x317   :  { %1925 = vmatpush1.bf16.msra.mxu0 %v3151_v41 }
 0x318   :  { %2743 = vmatprep.subr.bf16.mxu0 %v3202_v13  ;;  %v3214_v13 = vld [vmem:[%s4304_s11 + $0x70] sm:$0xff]  }
 0x31a   :  { %1927 = vmatmul.mubr.bf16.vlgmr.msra.gmra.mrb[12].mxu0 %v4018_v6  ;;  %v3192_v6 = vld [vmem:[%s4302_s9 + $0xc4] ss:$8 sps:$4 sm:$0xff]  }
 0x31b   :  { %2234 = vmatprep.subr.bf16.mxu1 %v3192_v6  ;;  %2744 = vmatpush3.bf16.msra.mxu0 %v3203_v14  ;;  %v3215_v14 = vld [vmem:[%s4304_s11 + $0x30] sm:$0xff]  }
 0x31c   :  { %2235 = vmatpush1.bf16.msra.mxu1 %v3190_v7  ;;  %2745 = vmatprep.subr.bf16.mxu0 %v3204_v15  ;;  %v3216_v15 = vld [vmem:[%s4304_s11 + $0x78] sm:$0xff]  }
 0x31d   :  { %2236 = vmatprep.subr.bf16.mxu1 %v3195_v8 }
 0x31f   :  { %2746 = vmatpush3.bf16.msra.mxu0 %v3205_v16  ;;  %v3217_v16 = vld [vmem:[%s4304_s11 + $0x38] sm:$0xff]  }
 0x320   :  { %2237 = vmatpush1.bf16.msra.mxu1 %v3193_v26  ;;  %2747 = vmatprep.subr.bf16.mxu0 %v3206_v17  ;;  %v2038_v17 = vld [vmem:[%s4303_s10] sm:$0x3] }
 0x321   :  { %2238 = vmatprep.subr.bf16.mxu1 %v3198_v9 }
 0x323   :  { %2748 = vmatpush3.bf16.msra.mxu0 %v3207_v18  ;;  %v1360_v18 = vrot.slane %v1339_v33, %v343_v53 }
 0x324   :  { %2239 = vmatpush1.bf16.msra.mxu1 %v3196_v10  ;;  %2749 = vmatprep.subr.bf16.mxu0 %v3208_v19  ;;  %v2043_v19 = vrot.slane %v2038_v17, %v3589_v21 }
 0x325   :  { %2240 = vmatprep.subr.bf16.mxu1 %v3201_v11 }
 0x327   :  { %2750 = vmatpush3.bf16.msra.mxu0 %v3209_v22  ;;  %v1364_v22 = vrot.slane %v1339_v33, %v347_v55 }
 0x328   :  { %2241 = vmatpush1.bf16.msra.mxu1 %v3199_v12  ;;  %2751 = vmatprep.subr.bf16.mxu0 %v3210_v24  ;;  %v2047_v24 = vrot.slane %v2038_v17, %v3595_v23 }
 0x32b   :  { %2752 = vmatpush3.bf16.msra.mxu0 %v3211_v25  ;;  %v2773_v25 = vadd.f32 %v2043_v19, %v1360_v18 }
 0x32c   :  { %2753 = vmatprep.subr.bf16.mxu0 %v3212_v27 }
 0x32f   :  { %2754 = vmatpush3.bf16.msra.mxu0 %v3213_v28  ;;  %v2775_v28 = vadd.f32 %v2047_v24, %v1364_v22 }
 0x330   :  { %2755 = vmatprep.subr.bf16.mxu0 %v3214_v13 }
 0x333   :  { %2756 = vmatpush3.bf16.msra.mxu0 %v3215_v14 }
 0x334   :  { %2757 = vmatprep.subr.bf16.mxu0 %v3216_v15 }
 0x337   :  { %2758 = vmatpush3.bf16.msra.mxu0 %v3217_v16 }
 0x3ad   :  { %v1885_v29 = vpop.f32.mrb[8].mxu0 }
 0x3ae   :  { %v1887_v30 = vpop.f32.mrb[9].mxu0  ;;  %v1886_v36 = vadd.f32 %v1885_v29, %v1344_v34 }
 0x3af   :  { %v1889_v31 = vpop.f32.mrb[10].mxu0  ;;  %v1888_v37 = vadd.f32 %v1887_v30, %v1348_v35 }
 0x3b0   :  { %v1891_v32 = vpop.f32.mrb[11].mxu0  ;;  %v1890_v38 = vadd.f32 %v1889_v31, %v1344_v34  ;;  %v1984_v40 = vmul.f32 0.70710677, %v1886_v36  ;;  %v1980_v56 = vmul.f32 0.5, %v1886_v36 }
 0x3b1   :  { %v1892_v39 = vadd.f32 %v1891_v32, %v1348_v35  ;;  %v1985_v41 = vmul.f32 0.70710677, %v1888_v37  ;;  %v1981_v58 = vmul.f32 0.5, %v1888_v37 }
 0x3b2   :  { %v1986_v42 = vmul.f32 0.70710677, %v1890_v38  ;;  %3234 = verf.f32 %v1984_v40  ;;  %v1982_v61 = vmul.f32 0.5, %v1890_v38 }
 0x3b3   :  { %v1987_v43 = vmul.f32 0.70710677, %v1892_v39  ;;  %3236 = verf.f32 %v1985_v41  ;;  %v1983_v1 = vmul.f32 0.5, %v1892_v39 }
 0x3b4   :  { %3238 = verf.f32 %v1986_v42 }
 0x3b5   :  { %3240 = verf.f32 %v1987_v43 }
 0x3bc   :  { %v3235_v44 = vpop.eup %3234 }
 0x3bd   :  { %v3237_v47 = vpop.eup %3236  ;;  %v1992_v50 = vadd.f32 1.0, %v3235_v44 }
 0x3be   :  { %v3239_v48 = vpop.eup %3238  ;;  %v1993_v52 = vadd.f32 1.0, %v3237_v47 }
 0x3bf   :  { %v3241_v49 = vpop.eup %3240  ;;  %v1994_v57 = vadd.f32 1.0, %v3239_v48  ;;  %v1996_v63 = vmul.f32 %v1992_v50, %v1980_v56 }
 0x3c0   :  { %v1995_v59 = vadd.f32 1.0, %v3241_v49  ;;  %v1997_v3 = vmul.f32 %v1993_v52, %v1981_v58 }
 0x3c1   :  { %v1998_v45 = vmul.f32 %v1994_v57, %v1982_v61 }
 0x3c2   :  { %v1999_v46 = vmul.f32 %v1995_v59, %v1983_v1 }
 0x3ed   :  { %v1928_v60 = vpop.f32.mrb[12].mxu0 }
 0x3ee   :  { %v1929_v62 = vadd.f32 %v1928_v60, %v1352_v51  ;;  %v1930_v0 = vpop.f32.mrb[13].mxu0 }
 0x3ef   :  { %v1931_v2 = vadd.f32 %v1930_v0, %v1356_v54  ;;  %v1932_v4 = vpop.f32.mrb[14].mxu0 }
 0x3f0   :  { %v2000_v5 = vmul.f32 %v1996_v63, %v1929_v62  ;;  %v1933_v6 = vadd.f32 %v1932_v4, %v1352_v51  ;;  %v1934_v7 = vpop.f32.mrb[15].mxu0 }
 0x3f1   :  { %v2001_v8 = vmul.f32 %v1997_v3, %v1931_v2  ;;  %v1935_v26 = vadd.f32 %v1934_v7, %v1356_v54 }
 0x3f2   :  { %v2002_v9 = vmul.f32 %v1998_v45, %v1933_v6 }
 0x3f3   :  { %v2003_v10 = vmul.f32 %v1999_v46, %v1935_v26 }
 0x3f4   :  { %v2004_v11 = vpack.c.bf16 %v2002_v9, %v2000_v5 }
 0x3f5   :  { %v2005_v12 = vpack.c.bf16 %v2003_v10, %v2001_v8 }
 0x3f7   :  { %2242 = vmatprep.mubr.bf16.mxu1 %v2005_v12 }
 0x3f8   :  { %2243 = vmatmul.mubr.bf16.vlgmr.msra.gmra.mrb[8].mxu1 %v2004_v11 }
 0x4cb   :  { %v2244_v27 = vpop.f32.mrb[8].mxu1 }
 0x4cc   :  { %v2246_v29 = vpop.f32.mrb[9].mxu1  ;;  %v2774_v31 = vadd.f32 %v2773_v25, %v2244_v27 }
 0x4cd   :  { %v2248_v30 = vpop.f32.mrb[10].mxu1  ;;  %v2776_v35 = vadd.f32 %v2775_v28, %v2246_v29 }
 0x4ce   :  { %v2778_v32 = vadd.f32 %v2773_v25, %v2248_v30  ;;  %v2250_v34 = vpop.f32.mrb[11].mxu1 }
 0x4cf   :  { %v2780_v36 = vadd.f32 %v2775_v28, %v2250_v34 }
 0x4d0   :  { %v2257_v37 = vpack.c.bf16 %v2778_v32, %v2774_v31 }
 0x4d1   :  { %v2258_v38 = vpack.c.bf16 %v2780_v36, %v2776_v35 }
 0x4d3   :  { %2426 = vmatprep.mubr.bf16.mxu0 %v2258_v38 }
 0x4d4   :  { %2427 = vmatmul.mubr.bf16.vlgmr.msra.gmra.mrb[16].mxu0 %v2257_v37 }
 0x5a7   :  { %v2759_v21 = vpop.f32.mrb[16].mxu0 }
 0x5a8   :  { %v2760_v23 = vpop.f32.mrb[17].mxu0 }
 0x5a9   :  { %v2761_v53 = vadd.f32 %v2760_v23, %v2759_v21  ;;  %v2762_v55 = vpop.f32.mrb[18].mxu0 }
 0x5aa   :  { %v2763_v33 = vpop.f32.mrb[19].mxu0 }
 0x5ab   :  { %v2429_v39 = vadd.f32 %v2761_v53, %v2726_v20  ;;  %v2764_v40 = vadd.f32 %v2763_v33, %v2762_v55 }
 0x5ad   :  { %2435 = vst [vmem:[#allocation2] sm:$0xff] %v2429_v39  ;;  %v2432_v41 = vadd.f32 %v2764_v40, %v2726_v20 }
 0x5af   :  { %2436 = vst [vmem:[#allocation2 + $0x8] sm:$0xff] %v2432_v41 }
 0x5b0   :  { %3253 = shalt.err (!%p3250_p4)
}
 0x5b1   :  { %s3254_s21 = scalar_lea.hbm %s4306_s13, 256 }
 0x5b2   :  { %p3255_p5 = scmp.ne.s32.totalorder %s4306_s13, %s3254_s21  ;;  %p3258_p6 = scmp.lt.u32.totalorder %s3254_s21, %s4306_s13 }
 0x5b4   :  { %p3260_p7 = pnand %p3258_p6, %p3255_p5 }
 0x5b6   :  { %3263 = shalt.err (!%p3260_p7)
}
 0x5b7   :  { %s3268_s24 = smov 128   ;;  %s3269_s7 = smov 8  }
 0x5b8   :  { %2448 = dma.vmem_to_hbm [thread:$0]  %s2443_s18, 256, %s4306_s13, [#allocation3], %s3268_s24, %s3268_s24, %s3269_s7  }
 0x5b9   :  { %3264 = dma.done.wait [#allocation3], 256  }
 0x5ba   :  { %3265 = vsyncadd [#allocation3], 4294967040 }
 0x5bb   :  { %2452 = vsyncpa [#allocation3], 1 }

</bundles_post_ra>
